<compile_context>
chip_gen: v6e
topology: v6e:2x2x1
jax: 0.10.0
libtpu: 0.0.40
codegen_flags: <defaults>
</compile_context>

<pallas_src>
import jax
import jax.numpy as jnp
from jax import lax
from jax.experimental import pallas as pl
from jax.experimental.pallas import tpu as pltpu


def init_params(key, in_c, c1, c2, c3):
    """normal_init(m, 0, 0.01): weight ~ N(0, 0.01), bias = 0 (PyTorch OIHW weights)."""
    k1, k2, k3, k4 = jax.random.split(key, 4)
    std = 0.01
    w1_t = jax.random.normal(k1, (c1, in_c, 1, 1), jnp.float32) * std
    w2a_t = jax.random.normal(k2, (c2[0], in_c, 1, 1), jnp.float32) * std
    w2b_t = jax.random.normal(k3, (c2[1], c2[0], 3, 3), jnp.float32) * std
    w3_t = jax.random.normal(k4, (c3, in_c, 1, 1), jnp.float32) * std
    torch_params = (w1_t, w2a_t, w2b_t, w3_t)          # biases are all zero

    c20, c21 = c2
    # Fused 1x1 weight, rows = [w1 ; w2a ; w3]  -> (c1 + c20 + c3, in_c)
    w1cat = jnp.concatenate(
        [w1_t[:, :, 0, 0], w2a_t[:, :, 0, 0], w3_t[:, :, 0, 0]], axis=0)
    # Fused 1x1 bias (branch-3 bias is applied after the commuted pool, so zero here).
    b1cat = jnp.zeros((c1 + c20 + c3, 1), jnp.float32)
    # Fused per-tap weight for [3x3 conv | 3x3 avg-pool]: tap t = dy*3+dx occupies
    # columns [t*(c20+c3), (t+1)*(c20+c3)) and is block-diag(w2b[:,:,dy,dx], I/9).
    eye9 = jnp.eye(c3, dtype=jnp.float32) / 9.0
    blocks = []
    for dy in range(3):
        for dx in range(3):
            top = jnp.concatenate(
                [w2b_t[:, :, dy, dx], jnp.zeros((c21, c3), jnp.float32)], axis=1)
            bot = jnp.concatenate(
                [jnp.zeros((c3, c20), jnp.float32), eye9], axis=1)
            blocks.append(jnp.concatenate([top, bot], axis=0))   # (c21+c3, c20+c3)
    wtap = jnp.concatenate(blocks, axis=1)                       # (c21+c3, 9*(c20+c3))
    b2cat = jnp.zeros((c21 + c3, 1), jnp.float32)                # [b2b ; b3] (zero)

    kernel_params = (w1cat, b1cat, wtap, b2cat, (c1, c20, c21, c3))
    return torch_params, kernel_params


def inception3_forward(x_nchw, kernel_params, *, compute_dtype=jnp.float32):
    """x_nchw: (N, Cin, H, W). Returns (N, c1 + c2[1] + c3, H, W) in NCHW."""
    w1cat, b1cat, wtap, b2cat, dims = kernel_params
    c1, c20, c21, c3 = dims
    N, Cin, H, W = x_nchw.shape
    HW = H * W
    c1x1 = c1 + c20 + c3          # fused 1x1 output rows
    C2 = c20 + c3                 # channels feeding the fused 3x3 stage
    c23 = c21 + c3                # fused tap output rows (p2 | p3)
    cout = c1 + c21 + c3

    # Free reshapes only (no transposes): (N, C, H, W) -> (N, C, H*W).
    x = x_nchw.reshape(N, Cin, HW).astype(compute_dtype)
    w1c = w1cat.astype(compute_dtype)
    wtc = wtap.astype(compute_dtype)

    # Precomputed boundary masks for the 9 taps of the zero-padded 3x3 window,
    # flattened over space: tapmask[dy*3+dx, i*W+j] = 1 iff (i+dy-1, j+dx-1) is
    # inside the image.
    ii = jnp.arange(H)[:, None]
    jj = jnp.arange(W)[None, :]
    rows = []
    for dy in range(3):
        for dx in range(3):
            si, sj = dy - 1, dx - 1
            ok = ((ii + si >= 0) & (ii + si < H) &
                  (jj + sj >= 0) & (jj + sj < W))
            rows.append(ok.reshape(1, HW))
    tapmask = jnp.concatenate(rows, axis=0).astype(jnp.float32)   # (9, HW)

    def kernel(x_ref, w1_ref, b1_ref, wt_ref, b2_ref, m_ref, o_ref):
        xm = x_ref[0]                                             # (Cin, HW)

        # ---- all three 1x1 convolutions: one MXU pass over x ----
        y = jnp.dot(w1_ref[...], xm, preferred_element_type=jnp.float32)
        y = y + b1_ref[...]                                       # (c1x1, HW) f32
        # ReLU only the p1 / p2a rows; branch-3's 1x1 output stays linear because
        # its bias + ReLU are applied after the (commuted) average pool.
        row = lax.broadcasted_iota(jnp.int32, (c1x1, 1), 0)
        y = jnp.where(row < c1 + c20, jnp.maximum(y, 0.0), y)

        p1 = y[:c1, :]                                            # (c1, HW)
        z = y[c1:, :]                                             # (C2, HW) = [relu(p2a); w3*x]

        # ---- im2col of the 9 taps: one padded copy + shifted slices + masks ----
        zt = z.T                                                  # (HW, C2)
        zpad = jnp.zeros((W + 1, C2), zt.dtype)
        zp = jnp.concatenate([zpad, zt, zpad], axis=0)            # (HW + 2W + 2, C2)
        m = m_ref[...]                                            # (9, HW)

        taps = []
        for dy in range(3):
            for dx in range(3):
                t = dy * 3 + dx
                shift = (dy - 1) * W + (dx - 1)
                start = (W + 1) + shift
                sh = zp[start:start + HW, :]                      # source (i+dy-1, j+dx-1)
                tap = sh.T                                        # (C2, HW)
                if not (dy == 1 and dx == 1):                     # center tap: mask == 1
                    tap = tap * m[t:t + 1, :]
                taps.append(tap)
        patches = jnp.concatenate(taps, axis=0)                   # (9*C2, HW)

        # ---- branch-2 3x3 conv + branch-3 3x3 avg-pool: ONE im2col matmul ----
        acc = jnp.dot(wt_ref[...], patches.astype(wt_ref.dtype),
                      preferred_element_type=jnp.float32)         # (c23, HW)
        p23 = jnp.maximum(acc + b2_ref[...], 0.0)

        # ---- write channel slices of the lane-dense (cout, HW) output block ----
        o_ref[0, :c1, :] = p1.astype(o_ref.dtype)
        o_ref[0, c1:, :] = p23.astype(o_ref.dtype)

    def full_spec(shape):
        nd = len(shape)
        return pl.BlockSpec(shape, lambda n, _nd=nd: (0,) * _nd)

    itemsize = jnp.dtype(compute_dtype).itemsize
    flops = 2 * N * HW * (Cin * c1x1 + 9 * C2 * c23) + 8 * N * HW * cout
    bytes_accessed = (N * Cin * HW * itemsize + N * cout * HW * 4 +
                      (w1c.size + wtc.size) * itemsize +
                      (b1cat.size + b2cat.size + tapmask.size) * 4)

    out = pl.pallas_call(
        kernel,
        out_shape=jax.ShapeDtypeStruct((N, cout, HW), jnp.float32),
        grid=(N,),
        in_specs=[
            pl.BlockSpec((1, Cin, HW), lambda n: (n, 0, 0)),
            full_spec(w1c.shape), full_spec(b1cat.shape),
            full_spec(wtc.shape), full_spec(b2cat.shape),
            full_spec(tapmask.shape),
        ],
        out_specs=pl.BlockSpec((1, cout, HW), lambda n: (n, 0, 0)),
        compiler_params=pltpu.CompilerParams(
            dimension_semantics=("parallel",)),        # batch grid fills both v7x TCs
        cost_estimate=pl.CostEstimate(flops=flops, transcendentals=0,
                                      bytes_accessed=bytes_accessed),
    )(x, w1c, b1cat, wtc, b2cat, tapmask)

    return out.reshape(N, cout, H, W)


def reference_forward(x_nchw, torch_params):
    """Pure-JAX reference matching the PyTorch module (biases are zero)."""
    w1, w2a, w2b, w3 = torch_params
    dn = ('NCHW', 'OIHW', 'NCHW')

    def conv(v, w, pad):
        return lax.conv_general_dilated(v, w, (1, 1), pad, dimension_numbers=dn)

    relu = lambda v: jnp.maximum(v, 0.0)
    p1 = relu(conv(x_nchw, w1, 'VALID'))
    p2 = relu(conv(relu(conv(x_nchw, w2a, 'VALID')), w2b, ((1, 1), (1, 1))))
    # AvgPool2d(3, stride=1, padding=1) with count_include_pad=True -> window sum / 9
    s = lax.reduce_window(x_nchw, 0.0, lax.add, (1, 1, 3, 3), (1, 1, 1, 1),
                          ((0, 0), (0, 0), (1, 1), (1, 1)))
    p3 = relu(conv(s / 9.0, w3, 'VALID'))
    return jnp.concatenate([p1, p2, p3], axis=1)


if __name__ == "__main__":
    key = jax.random.PRNGKey(0)
    kx, kp = jax.random.split(key)

    # small shapes consistent with the module
    N, in_c, H, W = 2, 4, 16, 16
    c1, c2, c3 = 8, (8, 16), 8

    x = jax.random.normal(kx, (N, in_c, H, W), jnp.float32)
    torch_params, kernel_params = init_params(kp, in_c, c1, c2, c3)

    ref = jax.block_until_ready(reference_forward(x, torch_params))

    # f32 path: strict check against the PyTorch-semantics reference.
    out = jax.block_until_ready(inception3_forward(x, kernel_params))
    assert out.shape == (N, c1 + c2[1] + c3, H, W), out.shape
    assert jnp.allclose(out, ref, atol=1e-5, rtol=1e-4), \
        float(jnp.max(jnp.abs(out - ref)))

    # bf16 matmul inputs (f32 accumulation): 2x MXU throughput on v6e/v7x and half
    # the input DMA bytes; checked with a correspondingly looser tolerance.
    out_bf16 = jax.block_until_ready(
        inception3_forward(x, kernel_params, compute_dtype=jnp.bfloat16))
    assert jnp.allclose(out_bf16, ref, atol=1e-3, rtol=1e-1), \
        float(jnp.max(jnp.abs(out_bf16 - ref)))

    print("KERNEL_OK")
</pallas_src>

<mosaic_0001>
module attributes {stable_mosaic.version = 11 : i64} {
  func.func @kernel(%arg0: i32, %arg1: memref<1x4x256xf32, #tpu.memory_space<vmem>>, %arg2: memref<24x4xf32, #tpu.memory_space<vmem>>, %arg3: memref<24x1xf32, #tpu.memory_space<vmem>>, %arg4: memref<24x144xf32, #tpu.memory_space<vmem>>, %arg5: memref<24x1xf32, #tpu.memory_space<vmem>>, %arg6: memref<9x256xf32, #tpu.memory_space<vmem>>, %arg7: memref<1x32x256xf32, #tpu.memory_space<vmem>>) attributes {dimension_semantics = [#tpu.dimension_semantics<parallel>], iteration_bounds = array<i64: 2>, scalar_prefetch = 0 : i64, scratch_operands = 0 : i64, tpu.core_type = #tpu.core_type<tc>, window_params = [{transform_indices = @transform_0, window_bounds = array<i64: 1, 4, 256>}, {pipeline_mode = #tpu.pipeline_mode<synchronous>, transform_indices = @transform_1, window_bounds = array<i64: 24, 4>}, {pipeline_mode = #tpu.pipeline_mode<synchronous>, transform_indices = @transform_2, window_bounds = array<i64: 24, 1>}, {pipeline_mode = #tpu.pipeline_mode<synchronous>, transform_indices = @transform_3, window_bounds = array<i64: 24, 144>}, {pipeline_mode = #tpu.pipeline_mode<synchronous>, transform_indices = @transform_4, window_bounds = array<i64: 24, 1>}, {pipeline_mode = #tpu.pipeline_mode<synchronous>, transform_indices = @transform_5, window_bounds = array<i64: 9, 256>}, {transform_indices = @transform_6, window_bounds = array<i64: 1, 32, 256>}]} {
    %c0 = arith.constant 0 : index
    %c0_0 = arith.constant 0 : index
    %c0_1 = arith.constant 0 : index
    %0 = vector.load %arg1[%c0, %c0_0, %c0_1] : memref<1x4x256xf32, #tpu.memory_space<vmem>>, vector<1x4x256xf32>
    %1 = vector.shape_cast %0 : vector<1x4x256xf32> to vector<4x256xf32>
    %c0_2 = arith.constant 0 : index
    %c0_3 = arith.constant 0 : index
    %2 = vector.load %arg2[%c0_2, %c0_3] : memref<24x4xf32, #tpu.memory_space<vmem>>, vector<24x4xf32>
    %cst = arith.constant dense<0.000000e+00> : vector<24x256xf32>
    %3 = tpu.matmul %2, %1, %cst {dimension_numbers = #tpu.dot_dimension_numbers<[1], [0], [0], [1], [0, 0, 1, 1], [], []>} : vector<24x4xf32>, vector<4x256xf32>, vector<24x256xf32> -> vector<24x256xf32>
    %c0_4 = arith.constant 0 : index
    %c0_5 = arith.constant 0 : index
    %4 = vector.load %arg3[%c0_4, %c0_5] : memref<24x1xf32, #tpu.memory_space<vmem>>, vector<24x1xf32>
    %5 = vector.broadcast %4 : vector<24x1xf32> to vector<24x256xf32>
    %6 = arith.addf %3, %5 : vector<24x256xf32>
    %7 = tpu.iota {dimensions = array<i32: 0>} : vector<24x1xi32>
    %c16_i32 = arith.constant 16 : i32
    %8 = vector.broadcast %c16_i32 : i32 to vector<24x1xi32>
    %9 = arith.cmpi slt, %7, %8 : vector<24x1xi32>
    %cst_6 = arith.constant 0.000000e+00 : f32
    %10 = vector.broadcast %cst_6 : f32 to vector<24x256xf32>
    %11 = arith.maximumf %6, %10 : vector<24x256xf32>
    %12 = vector.shape_cast %9 : vector<24x1xi1> to vector<24x1xi1>
    %13 = vector.broadcast %12 : vector<24x1xi1> to vector<24x256xi1>
    %14 = arith.select %13, %11, %6 : vector<24x256xi1>, vector<24x256xf32>
    %15 = vector.extract_strided_slice %14 {offsets = [0, 0], sizes = [8, 256], strides = [1, 1]} : vector<24x256xf32> to vector<8x256xf32>
    %16 = vector.extract_strided_slice %14 {offsets = [8, 0], sizes = [16, 256], strides = [1, 1]} : vector<24x256xf32> to vector<16x256xf32>
    %17 = tpu.transpose %16, [1, 0] : vector<16x256xf32> -> vector<256x16xf32>
    %cst_7 = arith.constant 0.000000e+00 : f32
    %18 = vector.broadcast %cst_7 : f32 to vector<17x16xf32>
    %19 = tpu.concatenate %18, %17, %18 in 0 : vector<17x16xf32>, vector<256x16xf32>, vector<17x16xf32> -> vector<290x16xf32>
    %c0_8 = arith.constant 0 : index
    %c0_9 = arith.constant 0 : index
    %20 = vector.load %arg6[%c0_8, %c0_9] : memref<9x256xf32, #tpu.memory_space<vmem>>, vector<9x256xf32>
    %21 = vector.extract_strided_slice %19 {offsets = [0, 0], sizes = [256, 16], strides = [1, 1]} : vector<290x16xf32> to vector<256x16xf32>
    %22 = tpu.transpose %21, [1, 0] : vector<256x16xf32> -> vector<16x256xf32>
    %23 = vector.extract_strided_slice %20 {offsets = [0, 0], sizes = [1, 256], strides = [1, 1]} : vector<9x256xf32> to vector<1x256xf32>
    %24 = vector.broadcast %23 : vector<1x256xf32> to vector<16x256xf32>
    %25 = arith.mulf %22, %24 : vector<16x256xf32>
    %26 = vector.extract_strided_slice %19 {offsets = [1, 0], sizes = [256, 16], strides = [1, 1]} : vector<290x16xf32> to vector<256x16xf32>
    %27 = tpu.transpose %26, [1, 0] : vector<256x16xf32> -> vector<16x256xf32>
    %28 = vector.extract_strided_slice %20 {offsets = [1, 0], sizes = [1, 256], strides = [1, 1]} : vector<9x256xf32> to vector<1x256xf32>
    %29 = vector.broadcast %28 : vector<1x256xf32> to vector<16x256xf32>
    %30 = arith.mulf %27, %29 : vector<16x256xf32>
    %31 = vector.extract_strided_slice %19 {offsets = [2, 0], sizes = [256, 16], strides = [1, 1]} : vector<290x16xf32> to vector<256x16xf32>
    %32 = tpu.transpose %31, [1, 0] : vector<256x16xf32> -> vector<16x256xf32>
    %33 = vector.extract_strided_slice %20 {offsets = [2, 0], sizes = [1, 256], strides = [1, 1]} : vector<9x256xf32> to vector<1x256xf32>
    %34 = vector.broadcast %33 : vector<1x256xf32> to vector<16x256xf32>
    %35 = arith.mulf %32, %34 : vector<16x256xf32>
    %36 = vector.extract_strided_slice %19 {offsets = [16, 0], sizes = [256, 16], strides = [1, 1]} : vector<290x16xf32> to vector<256x16xf32>
    %37 = tpu.transpose %36, [1, 0] : vector<256x16xf32> -> vector<16x256xf32>
    %38 = vector.extract_strided_slice %20 {offsets = [3, 0], sizes = [1, 256], strides = [1, 1]} : vector<9x256xf32> to vector<1x256xf32>
    %39 = vector.broadcast %38 : vector<1x256xf32> to vector<16x256xf32>
    %40 = arith.mulf %37, %39 : vector<16x256xf32>
    %41 = vector.extract_strided_slice %19 {offsets = [17, 0], sizes = [256, 16], strides = [1, 1]} : vector<290x16xf32> to vector<256x16xf32>
    %42 = tpu.transpose %41, [1, 0] : vector<256x16xf32> -> vector<16x256xf32>
    %43 = vector.extract_strided_slice %19 {offsets = [18, 0], sizes = [256, 16], strides = [1, 1]} : vector<290x16xf32> to vector<256x16xf32>
    %44 = tpu.transpose %43, [1, 0] : vector<256x16xf32> -> vector<16x256xf32>
    %45 = vector.extract_strided_slice %20 {offsets = [5, 0], sizes = [1, 256], strides = [1, 1]} : vector<9x256xf32> to vector<1x256xf32>
    %46 = vector.broadcast %45 : vector<1x256xf32> to vector<16x256xf32>
    %47 = arith.mulf %44, %46 : vector<16x256xf32>
    %48 = vector.extract_strided_slice %19 {offsets = [32, 0], sizes = [256, 16], strides = [1, 1]} : vector<290x16xf32> to vector<256x16xf32>
    %49 = tpu.transpose %48, [1, 0] : vector<256x16xf32> -> vector<16x256xf32>
    %50 = vector.extract_strided_slice %20 {offsets = [6, 0], sizes = [1, 256], strides = [1, 1]} : vector<9x256xf32> to vector<1x256xf32>
    %51 = vector.broadcast %50 : vector<1x256xf32> to vector<16x256xf32>
    %52 = arith.mulf %49, %51 : vector<16x256xf32>
    %53 = vector.extract_strided_slice %19 {offsets = [33, 0], sizes = [256, 16], strides = [1, 1]} : vector<290x16xf32> to vector<256x16xf32>
    %54 = tpu.transpose %53, [1, 0] : vector<256x16xf32> -> vector<16x256xf32>
    %55 = vector.extract_strided_slice %20 {offsets = [7, 0], sizes = [1, 256], strides = [1, 1]} : vector<9x256xf32> to vector<1x256xf32>
    %56 = vector.broadcast %55 : vector<1x256xf32> to vector<16x256xf32>
    %57 = arith.mulf %54, %56 : vector<16x256xf32>
    %58 = vector.extract_strided_slice %19 {offsets = [34, 0], sizes = [256, 16], strides = [1, 1]} : vector<290x16xf32> to vector<256x16xf32>
    %59 = tpu.transpose %58, [1, 0] : vector<256x16xf32> -> vector<16x256xf32>
    %60 = vector.extract_strided_slice %20 {offsets = [8, 0], sizes = [1, 256], strides = [1, 1]} : vector<9x256xf32> to vector<1x256xf32>
    %61 = vector.broadcast %60 : vector<1x256xf32> to vector<16x256xf32>
    %62 = arith.mulf %59, %61 : vector<16x256xf32>
    %63 = tpu.concatenate %25, %30, %35, %40, %42, %47, %52, %57, %62 in 0 : vector<16x256xf32>, vector<16x256xf32>, vector<16x256xf32>, vector<16x256xf32>, vector<16x256xf32>, vector<16x256xf32>, vector<16x256xf32>, vector<16x256xf32>, vector<16x256xf32> -> vector<144x256xf32>
    %c0_10 = arith.constant 0 : index
    %c0_11 = arith.constant 0 : index
    %64 = vector.load %arg4[%c0_10, %c0_11] : memref<24x144xf32, #tpu.memory_space<vmem>>, vector<24x144xf32>
    %cst_12 = arith.constant dense<0.000000e+00> : vector<24x256xf32>
    %65 = tpu.matmul %64, %63, %cst_12 {dimension_numbers = #tpu.dot_dimension_numbers<[1], [0], [0], [1], [0, 0, 1, 1], [], []>} : vector<24x144xf32>, vector<144x256xf32>, vector<24x256xf32> -> vector<24x256xf32>
    %c0_13 = arith.constant 0 : index
    %c0_14 = arith.constant 0 : index
    %66 = vector.load %arg5[%c0_13, %c0_14] : memref<24x1xf32, #tpu.memory_space<vmem>>, vector<24x1xf32>
    %67 = vector.broadcast %66 : vector<24x1xf32> to vector<24x256xf32>
    %68 = arith.addf %65, %67 : vector<24x256xf32>
    %cst_15 = arith.constant 0.000000e+00 : f32
    %69 = vector.broadcast %cst_15 : f32 to vector<24x256xf32>
    %70 = arith.maximumf %68, %69 : vector<24x256xf32>
    %c0_16 = arith.constant 0 : index
    %c0_17 = arith.constant 0 : index
    %c0_18 = arith.constant 0 : index
    %71 = vector.load %arg7[%c0_16, %c0_17, %c0_18] : memref<1x32x256xf32, #tpu.memory_space<vmem>>, vector<1x8x256xf32>
    %72 = vector.shape_cast %71 : vector<1x8x256xf32> to vector<8x256xf32>
    %73 = vector.shape_cast %15 : vector<8x256xf32> to vector<1x8x256xf32>
    tpu.vector_store %arg7[%c0_16, %c0_17, %c0_18], %73 {strides = array<i32>} : memref<1x32x256xf32, #tpu.memory_space<vmem>>, vector<1x8x256xf32>,
    %c0_19 = arith.constant 0 : index
    %c8 = arith.constant 8 : index
    %c0_20 = arith.constant 0 : index
    %74 = vector.load %arg7[%c0_19, %c8, %c0_20] : memref<1x32x256xf32, #tpu.memory_space<vmem>>, vector<1x24x256xf32>
    %75 = vector.shape_cast %74 : vector<1x24x256xf32> to vector<24x256xf32>
    %76 = vector.shape_cast %70 : vector<24x256xf32> to vector<1x24x256xf32>
    tpu.vector_store %arg7[%c0_19, %c8, %c0_20], %76 {strides = array<i32>} : memref<1x32x256xf32, #tpu.memory_space<vmem>>, vector<1x24x256xf32>,
    return
  }
  func.func @transform_0(%arg0: i32) -> (i32, i32, i32) {
    %c0_i32 = arith.constant 0 : i32
    %c0_i32_0 = arith.constant 0 : i32
    %c0_i32_1 = arith.constant 0 : i32
    return %arg0, %c0_i32, %c0_i32_0 : i32, i32, i32
  }
  func.func @transform_1(%arg0: i32) -> (i32, i32) {
    %c0_i32 = arith.constant 0 : i32
    %c0_i32_0 = arith.constant 0 : i32
    %c0_i32_1 = arith.constant 0 : i32
    return %c0_i32, %c0_i32_0 : i32, i32
  }
  func.func @transform_2(%arg0: i32) -> (i32, i32) {
    %c0_i32 = arith.constant 0 : i32
    %c0_i32_0 = arith.constant 0 : i32
    %c0_i32_1 = arith.constant 0 : i32
    return %c0_i32, %c0_i32_0 : i32, i32
  }
  func.func @transform_3(%arg0: i32) -> (i32, i32) {
    %c0_i32 = arith.constant 0 : i32
    %c0_i32_0 = arith.constant 0 : i32
    %c0_i32_1 = arith.constant 0 : i32
    return %c0_i32, %c0_i32_0 : i32, i32
  }
  func.func @transform_4(%arg0: i32) -> (i32, i32) {
    %c0_i32 = arith.constant 0 : i32
    %c0_i32_0 = arith.constant 0 : i32
    %c0_i32_1 = arith.constant 0 : i32
    return %c0_i32, %c0_i32_0 : i32, i32
  }
  func.func @transform_5(%arg0: i32) -> (i32, i32) {
    %c0_i32 = arith.constant 0 : i32
    %c0_i32_0 = arith.constant 0 : i32
    %c0_i32_1 = arith.constant 0 : i32
    return %c0_i32, %c0_i32_0 : i32, i32
  }
  func.func @transform_6(%arg0: i32) -> (i32, i32, i32) {
    %c0_i32 = arith.constant 0 : i32
    %c0_i32_0 = arith.constant 0 : i32
    %c0_i32_1 = arith.constant 0 : i32
    return %arg0, %c0_i32, %c0_i32_0 : i32, i32, i32
  }
}

</mosaic_0001>

<bundles_post_ra>
// kernel: tpu_custom_call.1
= control target key start
LH: loop header
LB: loop body
LE: loop exit
PB: predicated region body
PF: predicated region fallthrough
CT: control target
= control target key end

     0   :  { %11 = vsyncpa [#allocation3], 0  ;;  %s3048_s0 = inlined_call_operand.hbm [shape: f32[2,4,256], index: 0, kind: input, shape index: {}]   ;;  %s3049_s1 = inlined_call_operand.vmem [shape: f32[24,4], index: 1, kind: input, shape index: {}]   ;;  %s3050_s2 = inlined_call_operand.vmem [shape: f32[24,1], index: 2, kind: input, shape index: {}]   ;;  %s3051_s3 = inlined_call_operand.vmem [shape: f32[24,144], index: 3, kind: input, shape index: {}]   ;;  %s3052_s4 = inlined_call_operand.vmem [shape: f32[24,1], index: 4, kind: input, shape index: {}]   ;;  %s3053_s5 = inlined_call_operand.vmem [shape: f32[9,256], index: 5, kind: input, shape index: {}]   ;;  %s3054_s6 = inlined_call_operand.hbm [shape: f32[2,32,256], index: 6, kind: output, shape index: {}]  }
   0x1   :  { %13 = vsyncpa [#allocation3 + $0x1], 0 }
   0x2   :  { %14 = vsyncpa [#allocation4], 0 }
   0x3   :  { %16 = vsyncpa [#allocation4 + $0x1], 0  ;;  %s1967_s21 = smov 0   ;;  %s1969_s22 = smov 0  }
   0x4   :  { %s1971_s23 = smov 0   ;;  %s1973_s24 = smov 0  }
   0x5 LB: > { %s1988_s25 = sadd.s32 4294967295, %s1924_s24   ;;  %s1717_s26 = sadd.s32 4294967294, %s1924_s24   ;;  %s1924_s24 = sphi %s1973_s24, %s3205_s24   ;;  %s1920_s23 = sphi %s1971_s23, %s3204_s23   ;;  %s1916_s22 = sphi %s1969_s22, %s3203_s22   ;;  %s1912_s21 = sphi %s1967_s21, %s3202_s21  }
   0x6   : > { %s1992_s27 = sadd.s32 1, %s1924_s24   ;;  %s29_s28 = sadd.s32 1, %s1920_s23 }
   0x7   : > { %s26_s29 = ssub.s32 %s1924_s24, %s1992_s27  ;;  %p36_p0 = scmp.ne.s32.totalorder %s1920_s23, %s1916_s22 }
   0x8   : > { %p27_p1 = scmp.eq.s32.totalorder %s26_s29, 0  ;;  %p37_p2 = scmp.eq.s32.totalorder %s1924_s24, 0 }
   0x9   : > { %p42_p3 = scmp.ne.s32.totalorder %s1916_s22, %s1912_s21  ;;  %p43_p4 = scmp.eq.s32.totalorder %s1988_s25, 0 }
   0xa   : > { %s2004_s30 = scalar_select %p27_p1, %s1920_s23, %s29_s28  }
   0xb   : > { %p2006_p5 = por %p37_p2, %p36_p0  ;;  %p2010_p6 = por %p43_p4, %p42_p3 }
   0xc   : > { %p171_p7 = scmp.eq.s32.totalorder %s1988_s25, 1  ;;  %p177_p8 = scmp.eq.s32.totalorder %s1717_s26, 1 }
   0xd   : > { %s3115_s8 = scalar_select %p2010_p6, 1, 0 }
   0xe   : > { %p1791_p10 = scmp.lt.s32.totalorder %s1924_s24, 2  ;;  %p2017_p11 = por %p171_p7, %p36_p0 }
   0xf   : > { %p2021_p12 = por %p177_p8, %p42_p3  ;;  %s212_s11 = sand.u32 1, %s1920_s23  }
  0x10   : > { %s3116_s9 = scalar_select %p2017_p11, 1, 0 }
  0x11   : > { %s3117_s10 = scalar_select %p2021_p12, 1, 0 }
  0x12   : > { %s1741_s12 = sshll.u32 %s1924_s24, 7  ;;  %s1720_s13 = sshll.u32 %s212_s11, 3 }
  0x13   : > { %s2030_s16 = scalar_lea.hbm %s3048_s0, %s1741_s12  ;;  %s216_s17 = scalar_lea.vmem [#allocation2], %s1720_s13 }
  0x14   : > { %s224_s18 = sshll.u32 %s216_s17, 4  ;;  %p2034_p13 = pnand %p1791_p10, %p2006_p5  ;;  %s2038_s18 = int_to_ptr.vmem [resolvable:$true] %s224_s18 }
  0x15   : > { %s213_s20 = scalar_lea.sflag [#allocation3], %s212_s11  ;;  %s1832_s26 = scalar_lea.hbm %s2030_s16, 128 }
  0x16   : > { %p1833_p2 = scmp.ne.s32.totalorder %s2030_s16, %s1832_s26  ;;  %p1834_p3 = pneg %p2034_p13 }
  0x17   : > { %s1837_s7 = scalar_lea.hbm %s3048_s0, 256  ;;  %p1838_p5 = scmp.lt.s32.totalorder %s2030_s16, %s3048_s0 }
  0x18   : > { %p1835_p4 = pnand %p1834_p3, %p1833_p2  ;;  %p1839_p8 = scmp.lt.s32.totalorder %s1837_s7, %s1832_s26 }
  0x1a   : > { %p1836_p7 = pneg %p1835_p4  ;;  %p1840_p10 = por %p1839_p8, %p1838_p5 }
  0x1c   : > { %p1841_p9 = pnand %p1840_p10, %p1836_p7 }
  0x1e   : > { %1844 = shalt.err (!%p1841_p9)
}
  0x1f   : > { %s1845_s11 = scalar_lea.vmem %s2038_s18, 128  ;;  %s1926_s14 = smov [#allocation2]  }
  0x20   : > { %p1846_p0 = scmp.ne.s32.totalorder %s2038_s18, %s1845_s11  ;;  %s1850_s15 = sshll.u32 %s1926_s14, 4  ;;  %s1851_s15 = int_to_ptr.vmem [resolvable:$false] %s1850_s15 }
  0x21   : > { %s1852_s17 = scalar_lea.vmem %s1851_s15, 256  ;;  %p1853_p4 = scmp.lt.s32.totalorder %s2038_s18, %s1851_s15 }
  0x22   : > { %p1848_p1 = pnand %p1846_p0, %p1834_p3  ;;  %p1854_p12 = scmp.lt.s32.totalorder %s1852_s17, %s1845_s11 }
  0x24   : > { %p1849_p2 = pneg %p1848_p1  ;;  %p1855_p11 = por %p1854_p12, %p1853_p4 }
  0x26   : > { %p1856_p6 = pnand %p1855_p11, %p1849_p2 }
  0x28   : > { %1859 = shalt.err (!%p1856_p6)
}
  0x29   : > { %1786 = dma.hbm_to_vmem [thread:$0]  (!%p2034_p13), %s2030_s16, 128, %s2038_s18, %s213_s20  }
  0x2a   : > { %p3119_p9 = scmp.lt.s32.totalorder %s1924_s24, 3  ;;  %p3120_p7 = scmp.ge.s32.totalorder %s1924_s24, 1 }
  0x2c   : > { %p230_p0 = pnand %p3120_p7, %p3119_p9 }
  0x2e   : > { %233 = sbr.rel (%p230_p0) target bundleno = 1304 (0x518), region = 44 }
  0x33   : > { %s2065_s26 = sand.u32 1, %s1916_s22   ;;  %p3121_p6 = scmp.ne.s32.totalorder %s3115_s8, 0 }
  0x34   : > { %s1724_s28 = sshll.u32 %s2065_s26, 3  ;;  %s236_s29 = scalar_lea.sflag [#allocation3], %s2065_s26 }
  0x35   : > { %s239_s7 = scalar_lea.vmem [#allocation2], %s1724_s28 }
  0x36   : > { %1903 = dma.done.wait (%p3121_p6), %s236_s29, 128  }
  0x37   : > { %1905 = vsyncadd (%p3121_p6), %s236_s29, 4294967168  ;;  %v1927_v0 = vmov 0.0   ;;  %v1928_v1 = vmov 0   ;;  %v268_v2 = vld [vmem:[%s239_s7] sm:$0xff]  ;;  %vm302_vm0 = vcmask 1043456   ;;  %vm292_vm1 = vcmask 31744  }
  0x38   : > { %371 = vmatprep.mubr.f32.mxu0 %v1927_v0  ;;  %1829 = vset.pattern.permute.xlu0 %v1928_v1  ;;  %v291_v3 = vcombine.high %v268_v2, %v268_v2  ;;  %v272_v4 = vld [vmem:[%s3050_s2] sm:$0xff]  ;;  %v274_v6 = vld [vmem:[%s3050_s2 + $0x10] sm:$0xff]  ;;  %v273_v7 = vld [vmem:[%s3050_s2 + $0x8] sm:$0xff]  ;;  %s1725_s29 = sshll.u32 %s2065_s26, 6  ;;  %vm511_vm2 = vcmask 1040384   ;;  %vm692_vm3 = vcmask 1046528  }
  0x39   : > { %1830 = vset.pattern.permute.xlu1 %v1928_v1  ;;  %v269_v5 = vld [vmem:[%s3049_s1] sm:$0xff]  ;;  %277 = vperm.xlu0 %1829, %v272_v4   ;;  %v270_v8 = vld [vmem:[%s3049_s1 + $0x8] sm:$0xff]  ;;  %v271_v9 = vld [vmem:[%s3049_s1 + $0x10] sm:$0xff]  ;;  %s2095_s7 = scalar_lea.vmem [#allocation5], %s1725_s29  ;;  %vm865_vm4 = vcmask 1045504   ;;  %vm1523_vm5 = vcmask 130048  }
  0x3a   : > { %1726 = vmatprep.subr.msk.mxu0 %vm302_vm0, %v291_v3  ;;  %287 = vperm.xlu1 %1830, %v274_v6   ;;  %s1644_s16 = sshll.u32 %s2095_s7, 4  ;;  %s1742_s18 = sshll.u32 %s1988_s25, 10  ;;  %s2996_s16 = int_to_ptr.vmem [resolvable:$true] %s1644_s16 }
  0x3b   : > { %1727 = vmatpush1.msk.msra.mxu0 %vm302_vm0, %v268_v2  ;;  %s3003_s8 = scalar_lea.hbm %s3054_s6, %s1742_s18  ;;  %s1631_s12 = scalar_lea.sflag [#allocation4], %s2065_s26 }
  0x3c   : > { %1728 = vmatmul.mubr.msk.f32.vlgmr.msra.gmra.mxu0 %vm292_vm1, %v269_v5  ;;  %s1860_s25 = scalar_lea.vmem %s2996_s16, 1024  ;;  %p3199_p12 = scmp.ne.s32.totalorder %s3116_s9, 0 }
  0x3d   : > { %377 = vmatprep.mubr.f32.mxu0 %v1927_v0  ;;  %282 = vperm.xlu0 %1829, %v273_v7   ;;  %p1861_p11 = scmp.ne.s32.totalorder %s2996_s16, %s1860_s25  ;;  %s1929_s13 = smov [#allocation5]  }
  0x3e   : > { %s1864_s11 = sshll.u32 %s1929_s13, 4  ;;  %s1865_s11 = int_to_ptr.vmem [resolvable:$false] %s1864_s11 }
  0x3f   : > { %p1862_p13 = pnand %p1861_p11, %p3199_p12  ;;  %s1866_s14 = scalar_lea.vmem %s1865_s11, 2048 }
  0x40   : > { %1729 = vmatmul.mubr.msk.f32.gmra.mxu0 %vm292_vm1, %v270_v8  ;;  %p1867_p3 = scmp.lt.s32.totalorder %s2996_s16, %s1865_s11  ;;  %p1868_p5 = scmp.lt.s32.totalorder %s1866_s14, %s1860_s25 }
  0x41   : > { %383 = vmatprep.mubr.f32.mxu0 %v1927_v0  ;;  %p1863_p1 = pneg %p1862_p13 }
  0x42   : > { %p1869_p8 = por %p1868_p5, %p1867_p3 }
  0x44   : > { %1730 = vmatmul.mubr.msk.f32.gmra.mxu0 %vm292_vm1, %v271_v9  ;;  %p1870_p10 = pnand %p1869_p8, %p1863_p1 }
  0xb4   : > { %v278_v10 = vpop.permute.xlu0 %277 }
  0xb5   : > { %v288_v21 = vpop.permute.xlu1 %287 }
  0xb8   : > { %v283_v16 = vpop.permute.xlu0 %282 }
  0xfc   : > { %v373_v11 = vpop.f32.mrf.mxu0 }
  0xfd   : > { %v374_v12 = vadd.f32 %v373_v11, %v278_v10 }
  0xfe   : > { %v375_v13 = vpop.f32.mrf.mxu0 }
  0xff   : > { %v397_v14 = vmax.f32 %v374_v12, 0.0  ;;  %v376_v15 = vadd.f32 %v375_v13, %v278_v10 }
 0x100   : > { %v379_v17 = vpop.f32.mrf.mxu0 }
 0x101   : > { %1622 = vst [vmem:[%s2095_s7] sm:$0xff] %v397_v14  ;;  %v398_v18 = vmax.f32 %v376_v15, 0.0  ;;  %v380_v19 = vadd.f32 %v379_v17, %v283_v16 }
 0x102   : > { %v381_v20 = vpop.f32.mrf.mxu0 }
 0x103   : > { %1623 = vst [vmem:[%s2095_s7 + $0x8] sm:$0xff] %v398_v18  ;;  %v399_v22 = vmax.f32 %v380_v19, 0.0  ;;  %v382_v23 = vadd.f32 %v381_v20, %v283_v16 }
 0x104   : > { %v385_v24 = vpop.f32.mrf.mxu0 }
 0x105   : > { %v400_v25 = vmax.f32 %v382_v23, 0.0  ;;  %415 = vxpose.xlu1.b32.start [1/2] (short) %v399_v22, 128  ;;  %v386_v26 = vadd.f32 %v385_v24, %v288_v21  ;;  %v2186_v24 = vrot.slane %v1927_v0, 1 }
 0x106   : > { %v387_v27 = vpop.f32.mrf.mxu0 }
 0x107   : > { %447 = vxpose.xlu0.b32.start [1/2] (short) %v400_v25, 128  ;;  %v388_v28 = vadd.f32 %v387_v27, %v288_v21  ;;  %3134 = vst [vmem:[#allocation20_spill] sm:$0xff] %v2186_v24 }
 0x109   : > { %416 = vxpose.xlu1.b32.end [2/2] (short) %v386_v26, 128 }
 0x10b   : > { %448 = vxpose.xlu0.b32.end [2/2] (short) %v388_v28, 128 }
 0x144   : > { %614 = vxpose.xlu0.b32.start [1/16] (narrow) %v1927_v0, 16 }
 0x148   : > { %615 = vxpose.xlu0.b32.cont [2/16] (narrow) %v1927_v0, 16 }
 0x181   : > { %v431_v29 = vpop.trf.xlu1 }
 0x182   : > { %v512_v30 = vrot.slane %v431_v29, 7 }
 0x183   : > { %v2101_v31 = vpop.trf.xlu0 }
 0x184   : > { %v2104_v32 = vsel %vm511_vm2, 0.0, %v512_v30 }
 0x185   : > { %616 = vxpose.xlu0.b32.cont [3/16] (narrow) %v2104_v32, 16  ;;  %v432_v33 = vpop.trf.xlu1  ;;  %v695_v26 = vrot.slane %v2104_v32, 1 }
 0x186   : > { %v513_v34 = vrot.slane %v432_v33, 7 }
 0x187   : > { %v2107_v35 = vpop.trf.xlu0 }
 0x188   : > { %v2110_v36 = vsel %vm511_vm2, %v512_v30, %v513_v34 }
 0x189   : > { %617 = vxpose.xlu0.b32.cont [4/16] (narrow) %v2110_v36, 16  ;;  %v433_v37 = vpop.trf.xlu1  ;;  %v697_v29 = vrot.slane %v2110_v36, 1 }
 0x18a   : > { %v515_v38 = vrot.slane %v433_v37, 7  ;;  %v543_v37 = vrot.slane %v2101_v31, 7 }
 0x18b   : > { %v2113_v39 = vpop.trf.xlu0  ;;  %v2210_v31 = vsel %vm692_vm3, %v695_v26, %v697_v29 }
 0x18c   : > { %v2116_v40 = vsel %vm511_vm2, %v513_v34, %v515_v38 }
 0x18d   : > { %3122 = vst [vmem:[#allocation8_spill] sm:$0xff] %v2116_v40  ;;  %618 = vxpose.xlu0.b32.cont [5/16] (narrow) %v2116_v40, 16  ;;  %v434_v41 = vpop.trf.xlu1 }
 0x18e   : > { %v517_v42 = vrot.slane %v434_v41, 7 }
 0x18f   : > { %v2119_v43 = vpop.trf.xlu0 }
 0x190   : > { %v2122_v44 = vsel %vm511_vm2, %v515_v38, %v517_v42 }
 0x191   : > { %3123 = vst [vmem:[#allocation9_spill] sm:$0xff] %v2122_v44  ;;  %619 = vxpose.xlu0.b32.cont [6/16] (narrow) %v2122_v44, 16  ;;  %v435_v45 = vpop.trf.xlu1 }
 0x192   : > { %v519_v46 = vrot.slane %v435_v45, 7 }
 0x193   : > { %v2125_v47 = vpop.trf.xlu0 }
 0x194   : > { %v2128_v48 = vsel %vm511_vm2, %v517_v42, %v519_v46  ;;  %v696_v42 = vsel %vm692_vm3, %v2186_v24, %v695_v26  ;;  %v549_v26 = vrot.slane %v2119_v43, 7 }
 0x195   : > { %3124 = vst [vmem:[#allocation10_spill] sm:$0xff] %v2128_v48  ;;  %620 = vxpose.xlu0.b32.cont [7/16] (narrow) %v2128_v48, 16  ;;  %v436_v49 = vpop.trf.xlu1 }
 0x196   : > { %v521_v50 = vrot.slane %v436_v49, 7  ;;  %v545_v49 = vrot.slane %v2107_v35, 7  ;;  %v699_v35 = vrot.slane %v2116_v40, 1 }
 0x197   : > { %v2131_v51 = vpop.trf.xlu0 }
 0x198   : > { %v2134_v52 = vsel %vm511_vm2, %v519_v46, %v521_v50 }
 0x199   : > { %3125 = vst [vmem:[#allocation11_spill] sm:$0xff] %v2134_v52  ;;  %621 = vxpose.xlu0.b32.cont [8/16] (narrow) %v2134_v52, 16  ;;  %v437_v53 = vpop.trf.xlu1 }
 0x19a   : > { %v523_v54 = vrot.slane %v437_v53, 7 }
 0x19b   : > { %v2137_v55 = vpop.trf.xlu0 }
 0x19c   : > { %v2140_v56 = vsel %vm511_vm2, %v521_v50, %v523_v54 }
 0x19d   : > { %3126 = vst [vmem:[#allocation12_spill] sm:$0xff] %v2140_v56  ;;  %622 = vxpose.xlu0.b32.cont [9/16] (narrow) %v2140_v56, 16  ;;  %v438_v57 = vpop.trf.xlu1 }
 0x19e   : > { %v525_v58 = vrot.slane %v438_v57, 7 }
 0x19f   : > { %v2143_v59 = vpop.trf.xlu0 }
 0x1a0   : > { %v2146_v60 = vsel %vm511_vm2, %v523_v54, %v525_v58 }
 0x1a1   : > { %3127 = vst [vmem:[#allocation13_spill] sm:$0xff] %v2146_v60  ;;  %623 = vxpose.xlu0.b32.cont [10/16] (narrow) %v2146_v60, 16  ;;  %v439_v61 = vpop.trf.xlu1 }
 0x1a2   : > { %v527_v62 = vrot.slane %v439_v61, 7 }
 0x1a3   : > { %v2149_v63 = vpop.trf.xlu0 }
 0x1a4   : > { %v2152_v1 = vsel %vm511_vm2, %v525_v58, %v527_v62 }
 0x1a5   : > { %3128 = vst [vmem:[#allocation14_spill] sm:$0xff] %v2152_v1  ;;  %624 = vxpose.xlu0.b32.cont [11/16] (narrow) %v2152_v1, 16  ;;  %v440_v2 = vpop.trf.xlu1 }
 0x1a6   : > { %v529_v3 = vrot.slane %v440_v2, 7 }
 0x1a7   : > { %v2155_v4 = vpop.trf.xlu0 }
 0x1a8   : > { %v2158_v5 = vsel %vm511_vm2, %v527_v62, %v529_v3 }
 0x1a9   : > { %3129 = vst [vmem:[#allocation15_spill] sm:$0xff] %v2158_v5  ;;  %625 = vxpose.xlu0.b32.cont [12/16] (narrow) %v2158_v5, 16  ;;  %v441_v6 = vpop.trf.xlu1 }
 0x1aa   : > { %v531_v7 = vrot.slane %v441_v6, 7 }
 0x1ab   : > { %v2161_v8 = vpop.trf.xlu0 }
 0x1ac   : > { %v2164_v9 = vsel %vm511_vm2, %v529_v3, %v531_v7 }
 0x1ad   : > { %3130 = vst [vmem:[#allocation16_spill] sm:$0xff] %v2164_v9  ;;  %626 = vxpose.xlu0.b32.cont [13/16] (narrow) %v2164_v9, 16  ;;  %v442_v10 = vpop.trf.xlu1 }
 0x1ae   : > { %v533_v11 = vrot.slane %v442_v10, 7 }
 0x1af   : > { %v2167_v12 = vpop.trf.xlu0 }
 0x1b0   : > { %v2170_v13 = vsel %vm511_vm2, %v531_v7, %v533_v11 }
 0x1b1   : > { %3131 = vst [vmem:[#allocation17_spill] sm:$0xff] %v2170_v13  ;;  %627 = vxpose.xlu0.b32.cont [14/16] (narrow) %v2170_v13, 16  ;;  %v443_v14 = vpop.trf.xlu1 }
 0x1b2   : > { %v535_v15 = vrot.slane %v443_v14, 7 }
 0x1b3   : > { %v2173_v16 = vpop.trf.xlu0 }
 0x1b4   : > { %v2176_v17 = vsel %vm511_vm2, %v533_v11, %v535_v15 }
 0x1b5   : > { %3132 = vst [vmem:[#allocation18_spill] sm:$0xff] %v2176_v17  ;;  %628 = vxpose.xlu0.b32.cont [15/16] (narrow) %v2176_v17, 16  ;;  %v444_v18 = vpop.trf.xlu1 }
 0x1b6   : > { %v537_v19 = vrot.slane %v444_v18, 7  ;;  %v2261_v18 = vsel %vm511_vm2, %v543_v37, %v545_v49 }
 0x1b7   : > { %v2179_v20 = vpop.trf.xlu0  ;;  %3139 = vst [vmem:[#allocation25_spill] sm:$0xff] %v2261_v18 }
 0x1b8   : > { %v2182_v21 = vsel %vm511_vm2, %v535_v15, %v537_v19  ;;  %v569_v34 = vrot.slane %v2179_v20, 7  ;;  %v870_v20 = vrot.slane %v2110_v36, 2 }
 0x1b9   : > { %3133 = vst [vmem:[#allocation19_spill] sm:$0xff] %v2182_v21  ;;  %629 = vxpose.xlu0.b32.end [16/16] (narrow) %v2182_v21, 16  ;;  %v445_v22 = vpop.trf.xlu1 }
 0x1ba   : > { %v539_v23 = vrot.slane %v445_v22, 7  ;;  %v2265_v22 = vsel %vm692_vm3, %v697_v29, %v699_v35  ;;  %v551_v29 = vrot.slane %v2125_v47, 7 }
 0x1bb   : > { %v477_v25 = vpop.trf.xlu0 }
 0x1bc   : > { %v2190_v27 = vsel %vm511_vm2, %v537_v19, %v539_v23  ;;  %v571_v28 = vrot.slane %v477_v25, 7  ;;  %v547_v19 = vrot.slane %v2113_v39, 7  ;;  %v2291_v43 = vsel %vm511_vm2, %v549_v26, %v551_v29 }
 0x1bd   : > { %3135 = vst [vmem:[#allocation21_spill] sm:$0xff] %v2190_v27  ;;  %789 = vxpose.xlu0.b32.start [1/16] (narrow) %v2186_v24, 16  ;;  %646 = vxpose.xlu1.b32.start [1/16] (narrow) %v2190_v27, 16  ;;  %v446_v30 = vpop.trf.xlu1  ;;  %v723_v57 = vrot.slane %v2190_v27, 1  ;;  %v3063_v58 = vrot.slane %v2190_v27, 2 }
 0x1be   : > { %v541_v33 = vrot.slane %v446_v30, 7  ;;  %v2205_v46 = vsel %vm511_vm2, %v569_v34, %v571_v28  ;;  %v2271_v25 = vsel %vm511_vm2, %v545_v49, %v547_v19  ;;  %v703_v30 = vrot.slane %v2128_v48, 1 }
 0x1bf   : > { %v478_v38 = vpop.trf.xlu0  ;;  %v3061_v62 = vrot.slane %v2205_v46, 1  ;;  %v3059_v7 = vrot.slane %v2205_v46, 2  ;;  %v2281_v39 = vsel %vm511_vm2, %v547_v19, %v549_v26  ;;  %v555_v49 = vrot.slane %v2137_v55, 7 }
 0x1c0   : > { %v2198_v41 = vsel %vm511_vm2, %v539_v23, %v541_v33  ;;  %v573_v45 = vrot.slane %v478_v38, 7  ;;  %v2227_v6 = vsel %vm511_vm2, %v541_v33, %v543_v37  ;;  %v701_v23 = vrot.slane %v2122_v44, 1 }
 0x1c1   : > { %790 = vxpose.xlu0.b32.cont [2/16] (narrow) %v696_v42, 16  ;;  %647 = vxpose.xlu1.b32.cont [2/16] (narrow) %v2198_v41, 16  ;;  %v3062_v50 = vrot.slane %v2198_v41, 1  ;;  %v3060_v53 = vrot.slane %v2198_v41, 2  ;;  %v705_v37 = vrot.slane %v2134_v52, 1  ;;  %v553_v38 = vrot.slane %v2131_v51, 7 }
 0x1c2   : > { %v2215_v54 = vsel %vm511_vm2, %v573_v45, 0.0  ;;  %v2220_v61 = vsel %vm511_vm2, %v571_v28, %v573_v45  ;;  %v2275_v28 = vsel %vm692_vm3, %v699_v35, %v701_v23  ;;  %v2285_v33 = vsel %vm692_vm3, %v701_v23, %v703_v30 }
 0x1c3   : > { %3136 = vst [vmem:[#allocation22_spill] sm:$0xff] %v2215_v54  ;;  %v3058_v2 = vrot.slane %v2220_v61, 1  ;;  %v3057_v3 = vrot.slane %v2220_v61, 2  ;;  %v2235_v10 = vsel %vm692_vm3, %v723_v57, %v3062_v50  ;;  %v2242_v11 = vsel %vm865_vm4, %v3063_v58, %v3060_v53 }
 0x1c4   : > { %v2295_v42 = vsel %vm692_vm3, %v703_v30, %v705_v37  ;;  %v707_v45 = vrot.slane %v2140_v56, 1  ;;  %v2301_v47 = vsel %vm511_vm2, %v551_v29, %v553_v38  ;;  %v709_v19 = vrot.slane %v2146_v60, 1 }
 0x1c5   : > { %791 = vxpose.xlu0.b32.cont [3/16] (narrow) %v2210_v31, 16  ;;  %648 = vxpose.xlu1.b32.cont [3/16] (narrow) %v2227_v6, 16  ;;  %v2251_v14 = vsel %vm692_vm3, %v3061_v62, %v3058_v2  ;;  %v2258_v15 = vsel %vm865_vm4, %v3059_v7, %v3057_v3  ;;  %v2311_v51 = vsel %vm511_vm2, %v553_v38, %v555_v49  ;;  %v557_v23 = vrot.slane %v2143_v59, 7 }
 0x1c6   : > { %3137 = vst [vmem:[#allocation23_spill] sm:$0xff] %v2251_v14  ;;  %3138 = vst [vmem:[#allocation24_spill] sm:$0xff] %v2258_v15  ;;  %v2305_v35 = vsel %vm692_vm3, %v705_v37, %v707_v45  ;;  %v2315_v26 = vsel %vm692_vm3, %v707_v45, %v709_v19  ;;  %v711_v30 = vrot.slane %v2152_v1, 1  ;;  %v559_v29 = vrot.slane %v2149_v63, 7 }
 0x1c7   : > { %v2321_v55 = vsel %vm511_vm2, %v555_v49, %v557_v23  ;;  %v713_v38 = vrot.slane %v2158_v5, 1  ;;  %v561_v45 = vrot.slane %v2155_v4, 7  ;;  %v715_v49 = vrot.slane %v2164_v9, 1 }
 0x1c8   : > { %v2325_v37 = vsel %vm692_vm3, %v709_v19, %v711_v30  ;;  %v2331_v59 = vsel %vm511_vm2, %v557_v23, %v559_v29  ;;  %v563_v19 = vrot.slane %v2161_v8, 7  ;;  %v717_v23 = vrot.slane %v2170_v13, 1 }
 0x1c9   : > { %792 = vxpose.xlu0.b32.cont [4/16] (narrow) %v2265_v22, 16  ;;  %649 = vxpose.xlu1.b32.cont [4/16] (narrow) %v2261_v18, 16  ;;  %v2335_v3 = vsel %vm692_vm3, %v711_v30, %v713_v38  ;;  %v2341_v63 = vsel %vm511_vm2, %v559_v29, %v561_v45  ;;  %v2345_v2 = vsel %vm692_vm3, %v713_v38, %v715_v49  ;;  %v565_v30 = vrot.slane %v2167_v12, 7 }
 0x1ca   : > { %v2351_v4 = vsel %vm511_vm2, %v561_v45, %v563_v19  ;;  %v2355_v7 = vsel %vm692_vm3, %v715_v49, %v717_v23  ;;  %v719_v29 = vrot.slane %v2176_v17, 1  ;;  %v567_v38 = vrot.slane %v2173_v16, 7 }
 0x1cb   : > { %v2361_v8 = vsel %vm511_vm2, %v563_v19, %v565_v30  ;;  %v721_v45 = vrot.slane %v2182_v21, 1 }
 0x1cc   : > { %v2365_v53 = vsel %vm692_vm3, %v717_v23, %v719_v29  ;;  %v2371_v12 = vsel %vm511_vm2, %v565_v30, %v567_v38  ;;  %v2381_v16 = vsel %vm511_vm2, %v567_v38, %v569_v34  ;;  %v2391_v23 = vrot.slane %v1927_v0, 2 }
 0x1cd   : > { %793 = vxpose.xlu0.b32.cont [5/16] (narrow) %v2275_v28, 16  ;;  %650 = vxpose.xlu1.b32.cont [5/16] (narrow) %v2271_v25, 16  ;;  %v2374_v49 = vsel %vm692_vm3, %v719_v29, %v721_v45  ;;  %v2386_v19 = vsel %vm692_vm3, %v721_v45, %v723_v57  ;;  %v868_v30 = vrot.slane %v2104_v32, 2  ;;  %v872_v0 = vrot.slane %v2116_v40, 2 }
 0x1ce   : > { %3140 = vst [vmem:[#allocation26_spill] sm:$0xff] %v2391_v23  ;;  %v874_v38 = vrot.slane %v2122_v44, 2 }
 0x1cf   : > { %v869_v34 = vsel %vm865_vm4, %v2391_v23, %v868_v30  ;;  %v2401_v57 = vsel %vm865_vm4, %v868_v30, %v870_v20  ;;  %v2407_v29 = vsel %vm865_vm4, %v870_v20, %v872_v0  ;;  %v876_v30 = vrot.slane %v2128_v48, 2 }
 0x1d0   : > { %v2413_v45 = vsel %vm865_vm4, %v872_v0, %v874_v38  ;;  %v878_v20 = vrot.slane %v2134_v52, 2  ;;  %v880_v0 = vrot.slane %v2140_v56, 2 }
 0x1d1   : > { %794 = vxpose.xlu0.b32.cont [6/16] (narrow) %v2285_v33, 16  ;;  %651 = vxpose.xlu1.b32.cont [6/16] (narrow) %v2281_v39, 16 }
 0x1d2   : > { %v2425_v62 = vsel %vm865_vm4, %v876_v30, %v878_v20  ;;  %v2431_v50 = vsel %vm865_vm4, %v878_v20, %v880_v0  ;;  %v886_v20 = vrot.slane %v2158_v5, 2 }
 0x1d5   : > { %795 = vxpose.xlu0.b32.cont [7/16] (narrow) %v2295_v42, 16  ;;  %652 = vxpose.xlu1.b32.cont [7/16] (narrow) %v2291_v43, 16 }
 0x1d9   : > { %796 = vxpose.xlu0.b32.cont [8/16] (narrow) %v2305_v35, 16  ;;  %653 = vxpose.xlu1.b32.cont [8/16] (narrow) %v2301_v47, 16 }
 0x1dd   : > { %797 = vxpose.xlu0.b32.cont [9/16] (narrow) %v2315_v26, 16  ;;  %654 = vxpose.xlu1.b32.cont [9/16] (narrow) %v2311_v51, 16 }
 0x1e1   : > { %798 = vxpose.xlu0.b32.cont [10/16] (narrow) %v2325_v37, 16  ;;  %655 = vxpose.xlu1.b32.cont [10/16] (narrow) %v2321_v55, 16 }
 0x1e5   : > { %799 = vxpose.xlu0.b32.cont [11/16] (narrow) %v2335_v3, 16  ;;  %656 = vxpose.xlu1.b32.cont [11/16] (narrow) %v2331_v59, 16 }
 0x1e9   : > { %800 = vxpose.xlu0.b32.cont [12/16] (narrow) %v2345_v2, 16  ;;  %657 = vxpose.xlu1.b32.cont [12/16] (narrow) %v2341_v63, 16 }
 0x1ed   : > { %801 = vxpose.xlu0.b32.cont [13/16] (narrow) %v2355_v7, 16  ;;  %658 = vxpose.xlu1.b32.cont [13/16] (narrow) %v2351_v4, 16 }
 0x1f1   : > { %802 = vxpose.xlu0.b32.cont [14/16] (narrow) %v2365_v53, 16  ;;  %659 = vxpose.xlu1.b32.cont [14/16] (narrow) %v2361_v8, 16 }
 0x1f5   : > { %803 = vxpose.xlu0.b32.cont [15/16] (narrow) %v2374_v49, 16  ;;  %660 = vxpose.xlu1.b32.cont [15/16] (narrow) %v2371_v12, 16 }
 0x1f9   : > { %804 = vxpose.xlu0.b32.end [16/16] (narrow) %v2386_v19, 16  ;;  %661 = vxpose.xlu1.b32.end [16/16] (narrow) %v2381_v16, 16 }
 0x1fd   : > { %962 = vxpose.xlu0.b32.start [1/16] (narrow) %v2391_v23, 16  ;;  %1070 = vxpose.xlu1.b32.start [1/16] (narrow) %v2227_v6, 16 }
 0x201   : > { %963 = vxpose.xlu0.b32.cont [2/16] (narrow) %v869_v34, 16  ;;  %1071 = vxpose.xlu1.b32.cont [2/16] (narrow) %v2261_v18, 16  ;;  %v2419_v34 = vsel %vm865_vm4, %v874_v38, %v876_v30  ;;  %v882_v38 = vrot.slane %v2146_v60, 2  ;;  %v884_v30 = vrot.slane %v2152_v1, 2 }
 0x203   : > { %v2437_v58 = vsel %vm865_vm4, %v880_v0, %v882_v38  ;;  %v2443_v23 = vsel %vm865_vm4, %v882_v38, %v884_v30  ;;  %v2449_v15 = vsel %vm865_vm4, %v884_v30, %v886_v20  ;;  %v888_v0 = vrot.slane %v2164_v9, 2 }
 0x204   : > { %3141 = vst [vmem:[#allocation27_spill] sm:$0xff] %v2449_v15  ;;  %v890_v38 = vrot.slane %v2170_v13, 2  ;;  %v892_v30 = vrot.slane %v2176_v17, 2 }
 0x205   : > { %964 = vxpose.xlu0.b32.cont [3/16] (narrow) %v2401_v57, 16  ;;  %1072 = vxpose.xlu1.b32.cont [3/16] (narrow) %v2271_v25, 16  ;;  %v2455_v24 = vsel %vm865_vm4, %v886_v20, %v888_v0  ;;  %v894_v20 = vrot.slane %v2182_v21, 2 }
 0x206   : > { %3142 = vst [vmem:[#allocation28_spill] sm:$0xff] %v2455_v24  ;;  %v2461_v14 = vsel %vm865_vm4, %v888_v0, %v890_v38  ;;  %v2467_v54 = vsel %vm865_vm4, %v890_v38, %v892_v30  ;;  %v3146_v0 = vrot.slane %v2190_v27, 2  ;;  %v727_v38 = vrot.slane %v2227_v6, 1 }
 0x207   : > { %3143 = vst [vmem:[#allocation29_spill] sm:$0xff] %v2461_v14  ;;  %3144 = vst [vmem:[#allocation30_spill] sm:$0xff] %v2467_v54 }
 0x209   : > { %965 = vxpose.xlu0.b32.cont [4/16] (narrow) %v2407_v29, 16  ;;  %1073 = vxpose.xlu1.b32.cont [4/16] (narrow) %v2281_v39, 16 }
 0x20d   : > { %966 = vxpose.xlu0.b32.cont [5/16] (narrow) %v2413_v45, 16  ;;  %1074 = vxpose.xlu1.b32.cont [5/16] (narrow) %v2291_v43, 16 }
 0x211   : > { %967 = vxpose.xlu0.b32.cont [6/16] (narrow) %v2419_v34, 16  ;;  %1075 = vxpose.xlu1.b32.cont [6/16] (narrow) %v2301_v47, 16 }
 0x215   : > { %968 = vxpose.xlu0.b32.cont [7/16] (narrow) %v2425_v62, 16  ;;  %1076 = vxpose.xlu1.b32.cont [7/16] (narrow) %v2311_v51, 16 }
 0x219   : > { %969 = vxpose.xlu0.b32.cont [8/16] (narrow) %v2431_v50, 16  ;;  %1077 = vxpose.xlu1.b32.cont [8/16] (narrow) %v2321_v55, 16 }
 0x21d   : > { %970 = vxpose.xlu0.b32.cont [9/16] (narrow) %v2437_v58, 16  ;;  %1078 = vxpose.xlu1.b32.cont [9/16] (narrow) %v2331_v59, 16 }
 0x221   : > { %971 = vxpose.xlu0.b32.cont [10/16] (narrow) %v2443_v23, 16  ;;  %1079 = vxpose.xlu1.b32.cont [10/16] (narrow) %v2341_v63, 16 }
 0x225   : > { %972 = vxpose.xlu0.b32.cont [11/16] (narrow) %v2449_v15, 16  ;;  %1080 = vxpose.xlu1.b32.cont [11/16] (narrow) %v2351_v4, 16 }
 0x229   : > { %973 = vxpose.xlu0.b32.cont [12/16] (narrow) %v2455_v24, 16  ;;  %1081 = vxpose.xlu1.b32.cont [12/16] (narrow) %v2361_v8, 16  ;;  %v2473_v24 = vsel %vm865_vm4, %v892_v30, %v894_v20  ;;  %v3147_v30 = vrot.slane %v2198_v41, 1 }
 0x22a   : > { %3145 = vst [vmem:[#allocation31_spill] sm:$0xff] %v2473_v24 }
 0x22d   : > { %974 = vxpose.xlu0.b32.cont [13/16] (narrow) %v2461_v14, 16  ;;  %1082 = vxpose.xlu1.b32.cont [13/16] (narrow) %v2371_v12, 16  ;;  %v2480_v14 = vsel %vm865_vm4, %v894_v20, %v3146_v0  ;;  %v731_v0 = vrot.slane %v2271_v25, 1 }
 0x231   : > { %975 = vxpose.xlu0.b32.cont [14/16] (narrow) %v2467_v54, 16  ;;  %1083 = vxpose.xlu1.b32.cont [14/16] (narrow) %v2381_v16, 16  ;;  %v729_v54 = vrot.slane %v2261_v18, 1 }
 0x233   : > { %v2496_v20 = vsel %vm692_vm3, %v727_v38, %v729_v54 }
 0x235   : > { %976 = vxpose.xlu0.b32.cont [15/16] (narrow) %v2473_v24, 16  ;;  %1084 = vxpose.xlu1.b32.cont [15/16] (narrow) %v2205_v46, 16  ;;  %v2490_v24 = vsel %vm692_vm3, %v3147_v30, %v727_v38  ;;  %v733_v30 = vrot.slane %v2281_v39, 1  ;;  %v735_v38 = vrot.slane %v2291_v43, 1 }
 0x239   : > { %977 = vxpose.xlu0.b32.end [16/16] (narrow) %v2480_v14, 16  ;;  %1085 = vxpose.xlu1.b32.end [16/16] (narrow) %v2220_v61, 16 }
 0x23d   : > { %1038 = vxpose.xlu0.b32.start [1/16] (narrow) %v2104_v32, 16  ;;  %821 = vxpose.xlu1.b32.start [1/16] (narrow) %v2235_v10, 16  ;;  %v2502_v32 = vsel %vm692_vm3, %v729_v54, %v731_v0  ;;  %v737_v54 = vrot.slane %v2301_v47, 1 }
 0x241   : > { %1039 = vxpose.xlu0.b32.cont [2/16] (narrow) %v2110_v36, 16  ;;  %822 = vxpose.xlu1.b32.cont [2/16] (narrow) %v2490_v24, 16  ;;  %v2508_v36 = vsel %vm692_vm3, %v731_v0, %v733_v30  ;;  %v739_v0 = vrot.slane %v2311_v51, 1 }
 0x245   : > { %1040 = vxpose.xlu0.b32.cont [3/16] (narrow) %v2116_v40, 16  ;;  %823 = vxpose.xlu1.b32.cont [3/16] (narrow) %v2496_v20, 16  ;;  %v2514_v40 = vsel %vm692_vm3, %v733_v30, %v735_v38  ;;  %v741_v30 = vrot.slane %v2321_v55, 1 }
 0x249   : > { %1041 = vxpose.xlu0.b32.cont [4/16] (narrow) %v2122_v44, 16  ;;  %824 = vxpose.xlu1.b32.cont [4/16] (narrow) %v2502_v32, 16  ;;  %v2520_v44 = vsel %vm692_vm3, %v735_v38, %v737_v54  ;;  %v743_v38 = vrot.slane %v2331_v59, 1 }
 0x24d   : > { %1042 = vxpose.xlu0.b32.cont [5/16] (narrow) %v2128_v48, 16  ;;  %825 = vxpose.xlu1.b32.cont [5/16] (narrow) %v2508_v36, 16  ;;  %v2526_v48 = vsel %vm692_vm3, %v737_v54, %v739_v0  ;;  %v745_v54 = vrot.slane %v2341_v63, 1 }
 0x251   : > { %1043 = vxpose.xlu0.b32.cont [6/16] (narrow) %v2134_v52, 16  ;;  %826 = vxpose.xlu1.b32.cont [6/16] (narrow) %v2514_v40, 16  ;;  %v2532_v52 = vsel %vm692_vm3, %v739_v0, %v741_v30  ;;  %v747_v0 = vrot.slane %v2351_v4, 1 }
 0x255   : > { %1044 = vxpose.xlu0.b32.cont [7/16] (narrow) %v2140_v56, 16  ;;  %827 = vxpose.xlu1.b32.cont [7/16] (narrow) %v2520_v44, 16  ;;  %v2538_v56 = vsel %vm692_vm3, %v741_v30, %v743_v38  ;;  %v749_v30 = vrot.slane %v2361_v8, 1 }
 0x259   : > { %1045 = vxpose.xlu0.b32.cont [8/16] (narrow) %v2146_v60, 16  ;;  %828 = vxpose.xlu1.b32.cont [8/16] (narrow) %v2526_v48, 16  ;;  %v2544_v60 = vsel %vm692_vm3, %v743_v38, %v745_v54  ;;  %v751_v38 = vrot.slane %v2371_v12, 1 }
 0x25d   : > { %1046 = vxpose.xlu0.b32.cont [9/16] (narrow) %v2152_v1, 16  ;;  %829 = vxpose.xlu1.b32.cont [9/16] (narrow) %v2532_v52, 16  ;;  %v2550_v1 = vsel %vm692_vm3, %v745_v54, %v747_v0  ;;  %v753_v54 = vrot.slane %v2381_v16, 1 }
 0x261   : > { %1047 = vxpose.xlu0.b32.cont [10/16] (narrow) %v2158_v5, 16  ;;  %830 = vxpose.xlu1.b32.cont [10/16] (narrow) %v2538_v56, 16  ;;  %v2556_v5 = vsel %vm692_vm3, %v747_v0, %v749_v30  ;;  %v3148_v0 = vrot.slane %v2205_v46, 1 }
 0x265   : > { %1048 = vxpose.xlu0.b32.cont [11/16] (narrow) %v2164_v9, 16  ;;  %831 = vxpose.xlu1.b32.cont [11/16] (narrow) %v2544_v60, 16  ;;  %v2562_v9 = vsel %vm692_vm3, %v749_v30, %v751_v38  ;;  %v900_v30 = vrot.slane %v2227_v6, 2 }
 0x269   : > { %1049 = vxpose.xlu0.b32.cont [12/16] (narrow) %v2170_v13, 16  ;;  %832 = vxpose.xlu1.b32.cont [12/16] (narrow) %v2550_v1, 16  ;;  %v2568_v13 = vsel %vm692_vm3, %v751_v38, %v753_v54  ;;  %v3149_v38 = vrot.slane %v2198_v41, 2 }
 0x26d   : > { %1050 = vxpose.xlu0.b32.cont [13/16] (narrow) %v2176_v17, 16  ;;  %833 = vxpose.xlu1.b32.cont [13/16] (narrow) %v2556_v5, 16  ;;  %v2575_v17 = vsel %vm692_vm3, %v753_v54, %v3148_v0  ;;  %v904_v0 = vrot.slane %v2271_v25, 2 }
 0x271   : > { %1051 = vxpose.xlu0.b32.cont [14/16] (narrow) %v2182_v21, 16  ;;  %834 = vxpose.xlu1.b32.cont [14/16] (narrow) %v2562_v9, 16  ;;  %v902_v21 = vrot.slane %v2261_v18, 2 }
 0x273   : > { %v2591_v54 = vsel %vm865_vm4, %v900_v30, %v902_v21 }
 0x275   : > { %1052 = vxpose.xlu0.b32.cont [15/16] (narrow) %v2190_v27, 16  ;;  %835 = vxpose.xlu1.b32.cont [15/16] (narrow) %v2568_v13, 16  ;;  %v2585_v27 = vsel %vm865_vm4, %v3149_v38, %v900_v30  ;;  %v906_v38 = vrot.slane %v2281_v39, 2  ;;  %v908_v30 = vrot.slane %v2291_v43, 2 }
 0x277   : > { %v2609_v18 = vsel %vm865_vm4, %v906_v38, %v908_v30 }
 0x278   : > { %3152 = vst [vmem:[#allocation34_spill] sm:$0xff] %v2609_v18 }
 0x279   : > { %1053 = vxpose.xlu0.b32.end [16/16] (narrow) %v2198_v41, 16  ;;  %836 = vxpose.xlu1.b32.end [16/16] (narrow) %v2575_v17, 16 }
 0x27d   : > { %1121 = vxpose.xlu0.b32.start [1/16] (narrow) %v2210_v31, 16  ;;  %994 = vxpose.xlu1.b32.start [1/16] (narrow) %v2242_v11, 16  ;;  %v2597_v31 = vsel %vm865_vm4, %v902_v21, %v904_v0  ;;  %v910_v21 = vrot.slane %v2301_v47, 2 }
 0x27e   : > { %3150 = vst [vmem:[#allocation32_spill] sm:$0xff] %v2597_v31 }
 0x281   : > { %1122 = vxpose.xlu0.b32.cont [2/16] (narrow) %v2265_v22, 16  ;;  %995 = vxpose.xlu1.b32.cont [2/16] (narrow) %v2585_v27, 16  ;;  %v2603_v22 = vsel %vm865_vm4, %v904_v0, %v906_v38  ;;  %v912_v0 = vrot.slane %v2311_v51, 2  ;;  %v914_v38 = vrot.slane %v2321_v55, 2 }
 0x282   : > { %3151 = vst [vmem:[#allocation33_spill] sm:$0xff] %v2603_v22 }
 0x285   : > { %1123 = vxpose.xlu0.b32.cont [3/16] (narrow) %v2275_v28, 16  ;;  %996 = vxpose.xlu1.b32.cont [3/16] (narrow) %v2591_v54, 16 }
 0x289   : > { %1124 = vxpose.xlu0.b32.cont [4/16] (narrow) %v2285_v33, 16  ;;  %997 = vxpose.xlu1.b32.cont [4/16] (narrow) %v2597_v31, 16  ;;  %v2615_v31 = vsel %vm865_vm4, %v908_v30, %v910_v21  ;;  %v916_v30 = vrot.slane %v2331_v59, 2 }
 0x28a   : > { %3153 = vst [vmem:[#allocation35_spill] sm:$0xff] %v2615_v31 }
 0x28d   : > { %1125 = vxpose.xlu0.b32.cont [5/16] (narrow) %v2295_v42, 16  ;;  %998 = vxpose.xlu1.b32.cont [5/16] (narrow) %v2603_v22, 16  ;;  %v2621_v22 = vsel %vm865_vm4, %v910_v21, %v912_v0  ;;  %v918_v21 = vrot.slane %v2341_v63, 2 }
 0x28e   : > { %3154 = vst [vmem:[#allocation36_spill] sm:$0xff] %v2621_v22 }
 0x291   : > { %1126 = vxpose.xlu0.b32.cont [6/16] (narrow) %v2305_v35, 16  ;;  %999 = vxpose.xlu1.b32.cont [6/16] (narrow) %v2609_v18, 16  ;;  %v2627_v18 = vsel %vm865_vm4, %v912_v0, %v914_v38  ;;  %v920_v0 = vrot.slane %v2351_v4, 2 }
 0x292   : > { %3155 = vst [vmem:[#allocation37_spill] sm:$0xff] %v2627_v18 }
 0x295   : > { %1127 = vxpose.xlu0.b32.cont [7/16] (narrow) %v2315_v26, 16  ;;  %1000 = vxpose.xlu1.b32.cont [7/16] (narrow) %v2615_v31, 16  ;;  %v2633_v31 = vsel %vm865_vm4, %v914_v38, %v916_v30  ;;  %v922_v38 = vrot.slane %v2361_v8, 2 }
 0x296   : > { %3156 = vst [vmem:[#allocation38_spill] sm:$0xff] %v2633_v31 }
 0x299   : > { %1128 = vxpose.xlu0.b32.cont [8/16] (narrow) %v2325_v37, 16  ;;  %1001 = vxpose.xlu1.b32.cont [8/16] (narrow) %v2621_v22, 16  ;;  %v2639_v22 = vsel %vm865_vm4, %v916_v30, %v918_v21  ;;  %v924_v30 = vrot.slane %v2371_v12, 2 }
 0x29a   : > { %3157 = vst [vmem:[#allocation39_spill] sm:$0xff] %v2639_v22 }
 0x29d   : > { %1129 = vxpose.xlu0.b32.cont [9/16] (narrow) %v2335_v3, 16  ;;  %1002 = vxpose.xlu1.b32.cont [9/16] (narrow) %v2627_v18, 16  ;;  %v2645_v18 = vsel %vm865_vm4, %v918_v21, %v920_v0  ;;  %v926_v21 = vrot.slane %v2381_v16, 2 }
 0x29e   : > { %3158 = vst [vmem:[#allocation40_spill] sm:$0xff] %v2645_v18 }
 0x2a1   : > { %1130 = vxpose.xlu0.b32.cont [10/16] (narrow) %v2345_v2, 16  ;;  %1003 = vxpose.xlu1.b32.cont [10/16] (narrow) %v2633_v31, 16  ;;  %v2651_v31 = vsel %vm865_vm4, %v920_v0, %v922_v38  ;;  %v3160_v0 = vrot.slane %v2205_v46, 2 }
 0x2a2   : > { %3159 = vst [vmem:[#allocation41_spill] sm:$0xff] %v2651_v31 }
 0x2a5   : > { %1131 = vxpose.xlu0.b32.cont [11/16] (narrow) %v2355_v7, 16  ;;  %1004 = vxpose.xlu1.b32.cont [11/16] (narrow) %v2639_v22, 16  ;;  %v2657_v22 = vsel %vm865_vm4, %v922_v38, %v924_v30  ;;  %v3163_v38 = vld [vmem:[#allocation30_spill] sm:$0xff] }
 0x2a9   : > { %1132 = vxpose.xlu0.b32.cont [12/16] (narrow) %v2365_v53, 16  ;;  %1005 = vxpose.xlu1.b32.cont [12/16] (narrow) %v2645_v18, 16  ;;  %v2663_v18 = vsel %vm865_vm4, %v924_v30, %v926_v21  ;;  %v3164_v30 = vld [vmem:[#allocation31_spill] sm:$0xff] }
 0x2ad   : > { %1133 = vxpose.xlu0.b32.cont [13/16] (narrow) %v2374_v49, 16  ;;  %1006 = vxpose.xlu1.b32.cont [13/16] (narrow) %v2651_v31, 16  ;;  %v2670_v31 = vsel %vm865_vm4, %v926_v21, %v3160_v0  ;;  %v3165_v21 = vld [vmem:[#allocation22_spill] sm:$0xff] }
 0x2ae   : > { %v1117_v0 = vrot.slane %v3165_v21, 1 }
 0x2b1   : > { %1134 = vxpose.xlu0.b32.cont [14/16] (narrow) %v2386_v19, 16  ;;  %1007 = vxpose.xlu1.b32.cont [14/16] (narrow) %v2657_v22, 16 }
 0x2b5   : > { %1008 = vxpose.xlu1.b32.cont [15/16] (narrow) %v2663_v18, 16  ;;  %1135 = vxpose.xlu0.b32.cont [15/16] (narrow) %v2235_v10, 16 }
 0x2b9   : > { %1009 = vxpose.xlu1.b32.end [16/16] (narrow) %v2670_v31, 16  ;;  %1136 = vxpose.xlu0.b32.end [16/16] (narrow) %v2490_v24, 16 }
 0x2bd   : > { %1153 = vxpose.xlu1.b32.start [1/16] (narrow) %v2496_v20, 16  ;;  %1191 = vxpose.xlu0.b32.start [1/16] (narrow) %v2401_v57, 16  ;;  %v3161_v57 = vld [vmem:[#allocation28_spill] sm:$0xff] }
 0x2c1   : > { %1154 = vxpose.xlu1.b32.cont [2/16] (narrow) %v2502_v32, 16  ;;  %1192 = vxpose.xlu0.b32.cont [2/16] (narrow) %v2407_v29, 16  ;;  %v3162_v29 = vld [vmem:[#allocation29_spill] sm:$0xff] }
 0x2c5   : > { %1155 = vxpose.xlu1.b32.cont [3/16] (narrow) %v2508_v36, 16  ;;  %1193 = vxpose.xlu0.b32.cont [3/16] (narrow) %v2413_v45, 16 }
 0x2c9   : > { %1156 = vxpose.xlu1.b32.cont [4/16] (narrow) %v2514_v40, 16  ;;  %1194 = vxpose.xlu0.b32.cont [4/16] (narrow) %v2419_v34, 16 }
 0x2cd   : > { %1157 = vxpose.xlu1.b32.cont [5/16] (narrow) %v2520_v44, 16  ;;  %1195 = vxpose.xlu0.b32.cont [5/16] (narrow) %v2425_v62, 16 }
 0x2d1   : > { %1158 = vxpose.xlu1.b32.cont [6/16] (narrow) %v2526_v48, 16  ;;  %1196 = vxpose.xlu0.b32.cont [6/16] (narrow) %v2431_v50, 16 }
 0x2d5   : > { %1159 = vxpose.xlu1.b32.cont [7/16] (narrow) %v2532_v52, 16  ;;  %1197 = vxpose.xlu0.b32.cont [7/16] (narrow) %v2437_v58, 16 }
 0x2d9   : > { %1160 = vxpose.xlu1.b32.cont [8/16] (narrow) %v2538_v56, 16  ;;  %1198 = vxpose.xlu0.b32.cont [8/16] (narrow) %v2443_v23, 16 }
 0x2dd   : > { %1161 = vxpose.xlu1.b32.cont [9/16] (narrow) %v2544_v60, 16  ;;  %1199 = vxpose.xlu0.b32.cont [9/16] (narrow) %v2449_v15, 16  ;;  %v3166_v15 = vld [vmem:[#allocation23_spill] sm:$0xff] }
 0x2e1   : > { %1162 = vxpose.xlu1.b32.cont [10/16] (narrow) %v2550_v1, 16  ;;  %1200 = vxpose.xlu0.b32.cont [10/16] (narrow) %v3161_v57, 16 }
 0x2e5   : > { %1163 = vxpose.xlu1.b32.cont [11/16] (narrow) %v2556_v5, 16  ;;  %1201 = vxpose.xlu0.b32.cont [11/16] (narrow) %v3162_v29, 16  ;;  %v3167_v29 = vrot.slane %v2220_v61, 1 }
 0x2e7   : > { %v1118_v57 = vsel %vm692_vm3, %v3167_v29, %v1117_v0  ;;  %v3172_v29 = vld [vmem:[#allocation11_spill] sm:$0xff] }
 0x2e9   : > { %1164 = vxpose.xlu1.b32.cont [12/16] (narrow) %v2562_v9, 16  ;;  %1202 = vxpose.xlu0.b32.cont [12/16] (narrow) %v3163_v38, 16 }
 0x2ed   : > { %1165 = vxpose.xlu1.b32.cont [13/16] (narrow) %v2568_v13, 16  ;;  %1203 = vxpose.xlu0.b32.cont [13/16] (narrow) %v3164_v30, 16 }
 0x2f1   : > { %1166 = vxpose.xlu1.b32.cont [14/16] (narrow) %v2575_v17, 16  ;;  %1204 = vxpose.xlu0.b32.cont [14/16] (narrow) %v2480_v14, 16 }
 0x2f5   : > { %1167 = vxpose.xlu1.b32.cont [15/16] (narrow) %v3166_v15, 16  ;;  %1205 = vxpose.xlu0.b32.cont [15/16] (narrow) %v2242_v11, 16 }
 0x2f9   : > { %1168 = vxpose.xlu1.b32.end [16/16] (narrow) %v1118_v57, 16  ;;  %1206 = vxpose.xlu0.b32.end [16/16] (narrow) %v2585_v27, 16 }
 0x2fd   : > { %1377 = vxpose.xlu1.b32.start [1/16] (narrow) %v2508_v36, 16  ;;  %1345 = vxpose.xlu0.b32.start [1/16] (narrow) %v2275_v28, 16 }
 0x301   : > { %1378 = vxpose.xlu1.b32.cont [2/16] (narrow) %v2514_v40, 16  ;;  %1346 = vxpose.xlu0.b32.cont [2/16] (narrow) %v2285_v33, 16  ;;  %v3168_v40 = vld [vmem:[#allocation20_spill] sm:$0xff] }
 0x305   : > { %1379 = vxpose.xlu1.b32.cont [3/16] (narrow) %v2520_v44, 16  ;;  %1347 = vxpose.xlu0.b32.cont [3/16] (narrow) %v2295_v42, 16  ;;  %v1343_v44 = vsel %vm692_vm3, %v1117_v0, %v3168_v40 }
 0x309   : > { %1380 = vxpose.xlu1.b32.cont [4/16] (narrow) %v2526_v48, 16  ;;  %1348 = vxpose.xlu0.b32.cont [4/16] (narrow) %v2305_v35, 16  ;;  %v678_v48 = vlaneseq }
 0x30d   : > { %1381 = vxpose.xlu1.b32.cont [5/16] (narrow) %v2532_v52, 16  ;;  %1349 = vxpose.xlu0.b32.cont [5/16] (narrow) %v2315_v26, 16  ;;  %v630_v52 = vpop.trf.xlu0 }
 0x311   : > { %1382 = vxpose.xlu1.b32.cont [6/16] (narrow) %v2538_v56, 16  ;;  %1350 = vxpose.xlu0.b32.cont [6/16] (narrow) %v2325_v37, 16  ;;  %v662_v56 = vpop.trf.xlu1  ;;  %v3171_v37 = vld [vmem:[#allocation10_spill] sm:$0xff] }
 0x315   : > { %1383 = vxpose.xlu1.b32.cont [7/16] (narrow) %v2544_v60, 16  ;;  %1351 = vxpose.xlu0.b32.cont [7/16] (narrow) %v2335_v3, 16  ;;  %v2741_v60 = vshrl.u32 %v678_v48, 7  ;;  %v3170_v3 = vld [vmem:[#allocation9_spill] sm:$0xff] }
 0x317   : > { %v1104_v35 = vsub.s32 3, %v2741_v60  ;;  %v1028_v0 = vsub.s32 2, %v2741_v60 }
 0x319   : > { %1384 = vxpose.xlu1.b32.cont [8/16] (narrow) %v2550_v1, 16  ;;  %1352 = vxpose.xlu0.b32.cont [8/16] (narrow) %v2345_v2, 16  ;;  %v2746_v1 = vld [vmem:[%s3053_s5] sm:$0xff] }
 0x31d   : > { %1385 = vxpose.xlu1.b32.cont [9/16] (narrow) %v2556_v5, 16  ;;  %1353 = vxpose.xlu0.b32.cont [9/16] (narrow) %v2355_v7, 16  ;;  %v2751_v5 = vld [vmem:[%s3053_s5 + $0x8] sm:$0xff] }
 0x321   : > { %1386 = vxpose.xlu1.b32.cont [10/16] (narrow) %v2562_v9, 16  ;;  %1354 = vxpose.xlu0.b32.cont [10/16] (narrow) %v2365_v53, 16  ;;  %v3169_v9 = vld [vmem:[#allocation8_spill] sm:$0xff] }
 0x325   : > { %1387 = vxpose.xlu1.b32.cont [11/16] (narrow) %v2568_v13, 16  ;;  %1355 = vxpose.xlu0.b32.cont [11/16] (narrow) %v2374_v49, 16  ;;  %v680_v13 = vsub.s32 0, %v2741_v60 }
 0x327   : > { %v681_v53 = vrot.slane %v2746_v1, %v680_v13  ;;  %v685_v2 = vrot.slane %v2751_v5, %v680_v13 }
 0x329   : > { %1388 = vxpose.xlu1.b32.cont [12/16] (narrow) %v2575_v17, 16  ;;  %1356 = vxpose.xlu0.b32.cont [12/16] (narrow) %v2386_v19, 16  ;;  %v631_v17 = vpop.trf.xlu0  ;;  %v2760_v7 = vmul.f32 %v681_v53, %v630_v52 }
 0x32d   : > { %1389 = vxpose.xlu1.b32.cont [13/16] (narrow) %v3166_v15, 16  ;;  %1357 = vxpose.xlu0.b32.cont [13/16] (narrow) %v2235_v10, 16  ;;  %v2762_v10 = vmul.f32 %v685_v2, %v662_v56  ;;  %v2764_v15 = vmul.f32 %v681_v53, %v631_v17  ;;  %v805_v28 = vpop.trf.xlu0  ;;  %v3174_v17 = vld [vmem:[#allocation13_spill] sm:$0xff]  ;;  %v1105_v53 = vrot.slane %v2746_v1, %v1104_v35 }
 0x331   : > { %1390 = vxpose.xlu1.b32.cont [14/16] (narrow) %v1118_v57, 16  ;;  %1358 = vxpose.xlu0.b32.cont [14/16] (narrow) %v2490_v24, 16  ;;  %v663_v24 = vpop.trf.xlu1  ;;  %v806_v19 = vpop.trf.xlu0 }
 0x332   : > { %v2767_v42 = vmul.f32 %v685_v2, %v663_v24 }
 0x335   : > { %1391 = vxpose.xlu1.b32.cont [15/16] (narrow) %v1343_v44, 16  ;;  %1359 = vxpose.xlu0.b32.cont [15/16] (narrow) %v2496_v20, 16  ;;  %v1086_v33 = vpop.trf.xlu1  ;;  %v3173_v44 = vld [vmem:[#allocation12_spill] sm:$0xff] }
 0x339   : > { %1392 = vxpose.xlu1.b32.end [16/16] (narrow) %v3168_v40, 16  ;;  %1360 = vxpose.xlu0.b32.end [16/16] (narrow) %v2502_v32, 16  ;;  %v1087_v20 = vpop.trf.xlu1  ;;  %v978_v40 = vpop.trf.xlu0 }
 0x33d   : > { %1299 = vxpose.xlu1.b32.start [1/15] (short) (narrow) %v2271_v25, 16  ;;  %1267 = vxpose.xlu0.b32.start [1/16] (narrow) %v3169_v9, 16  ;;  %v855_v25 = vsub.s32 1, %v2741_v60  ;;  %v837_v56 = vpop.trf.xlu1  ;;  %v979_v9 = vpop.trf.xlu0 }
 0x33f   : > { %v856_v26 = vrot.slane %v2746_v1, %v855_v25  ;;  %v860_v52 = vrot.slane %v2751_v5, %v855_v25  ;;  %v3175_v25 = vld [vmem:[#allocation14_spill] sm:$0xff] }
 0x341   : > { %1300 = vxpose.xlu1.b32.cont [2/15] (short) (narrow) %v2281_v39, 16  ;;  %1268 = vxpose.xlu0.b32.cont [2/16] (narrow) %v3170_v3, 16  ;;  %v1109_v39 = vrot.slane %v2751_v5, %v1104_v35  ;;  %v2774_v49 = vmul.f32 %v856_v26, %v805_v28  ;;  %v2778_v36 = vmul.f32 %v856_v26, %v806_v19  ;;  %v838_v24 = vpop.trf.xlu1  ;;  %v3176_v35 = vld [vmem:[#allocation15_spill] sm:$0xff] }
 0x342   : > { %v2798_v2 = vmul.f32 %v860_v52, %v838_v24  ;;  %v1033_v28 = vrot.slane %v2751_v5, %v1028_v0  ;;  %v1333_v24 = vsub.s32 6, %v2741_v60 }
 0x343   : > { %v2776_v32 = vmul.f32 %v1109_v39, %v1086_v33  ;;  %v2780_v57 = vmul.f32 %v1109_v39, %v1087_v20 }
 0x345   : > { %1301 = vxpose.xlu1.b32.cont [3/15] (short) (narrow) %v2291_v43, 16  ;;  %1269 = vxpose.xlu0.b32.cont [3/16] (narrow) %v3171_v37, 16  ;;  %v1029_v43 = vrot.slane %v2746_v1, %v1028_v0  ;;  %v1010_v33 = vpop.trf.xlu1  ;;  %v3178_v0 = vld [vmem:[#allocation17_spill] sm:$0xff] }
 0x347   : > { %v2788_v48 = vmul.f32 %v1029_v43, %v978_v40  ;;  %v2791_v13 = vmul.f32 %v1029_v43, %v979_v9  ;;  %v1257_v40 = vsub.s32 5, %v2741_v60  ;;  %v3180_v9 = vld [vmem:[#allocation19_spill] sm:$0xff] }
 0x349   : > { %1302 = vxpose.xlu1.b32.cont [4/15] (short) (narrow) %v2301_v47, 16  ;;  %1270 = vxpose.xlu0.b32.cont [4/16] (narrow) %v3172_v29, 16  ;;  %v2793_v47 = vmul.f32 %v860_v52, %v837_v56  ;;  %v1011_v37 = vpop.trf.xlu1  ;;  %v1258_v43 = vrot.slane %v2746_v1, %v1257_v40 }
 0x34a   : > { %v2813_v20 = vmul.f32 %v1033_v28, %v1011_v37 }
 0x34d   : > { %1303 = vxpose.xlu1.b32.cont [5/15] (short) (narrow) %v2311_v51, 16  ;;  %1271 = vxpose.xlu0.b32.cont [5/16] (narrow) %v3173_v44, 16  ;;  %v1054_v51 = vpop.trf.xlu0  ;;  %v3179_v44 = vld [vmem:[#allocation18_spill] sm:$0xff] }
 0x34e   : > { %v2800_v3 = vmul.f32 %v1105_v53, %v1054_v51  ;;  %v3182_v51 = vld [vmem:[#allocation25_spill] sm:$0xff] }
 0x351   : > { %1304 = vxpose.xlu1.b32.cont [6/15] (short) (narrow) %v2321_v55, 16  ;;  %1272 = vxpose.xlu0.b32.cont [6/16] (narrow) %v3174_v17, 16  ;;  %v1055_v26 = vpop.trf.xlu0  ;;  %v2807_v55 = vmul.f32 %v1033_v28, %v1010_v33  ;;  %v2833_v17 = vpop.trf.xlu1 }
 0x352   : > { %v2805_v39 = vmul.f32 %v1105_v53, %v1055_v26  ;;  %v1411_v53 = vsub.s32 7, %v2741_v60  ;;  %v3183_v26 = vld [vmem:[#allocation32_spill] sm:$0xff]  ;;  %v1502_v60 = vld [vmem:[%s3051_s3 + $0x18] sm:$0xff] }
 0x353   : > { %1734 = vmatprep.mubr.msk.f32.mxu1 %vm1523_vm5, %v1502_v60 }
 0x354   : > { %v1416_v33 = vrot.slane %v2751_v5, %v1411_v53 }
 0x355   : > { %1305 = vxpose.xlu1.b32.cont [7/15] (short) (narrow) %v2331_v59, 16  ;;  %1273 = vxpose.xlu0.b32.cont [7/16] (narrow) %v3175_v25, 16  ;;  %v2811_v19 = vpop.trf.xlu0  ;;  %v3177_v59 = vld [vmem:[#allocation16_spill] sm:$0xff] }
 0x359   : > { %1306 = vxpose.xlu1.b32.cont [8/15] (short) (narrow) %v2341_v63, 16  ;;  %1274 = vxpose.xlu0.b32.cont [8/16] (narrow) %v3176_v35, 16  ;;  %v2817_v29 = vpop.trf.xlu0  ;;  %v3184_v35 = vld [vmem:[#allocation33_spill] sm:$0xff] }
 0x35d   : > { %1307 = vxpose.xlu1.b32.cont [9/15] (short) (narrow) %v2351_v4, 16  ;;  %1275 = vxpose.xlu0.b32.cont [9/16] (narrow) %v3177_v59, 16  ;;  %v1207_v63 = vpop.trf.xlu0 }
 0x35e   : > { %v2825_v52 = vmul.f32 %v1258_v43, %v1207_v63 }
 0x361   : > { %1308 = vxpose.xlu1.b32.cont [10/15] (short) (narrow) %v2361_v8, 16  ;;  %1276 = vxpose.xlu0.b32.cont [10/16] (narrow) %v3178_v0, 16  ;;  %v1208_v4 = vpop.trf.xlu0  ;;  %v3181_v8 = vld [vmem:[#allocation21_spill] sm:$0xff] }
 0x362   : > { %v2827_v56 = vmul.f32 %v1258_v43, %v1208_v4  ;;  %v3185_v43 = vld [vmem:[#allocation34_spill] sm:$0xff]  ;;  %v3188_v4 = vld [vmem:[#allocation37_spill] sm:$0xff] }
 0x365   : > { %1309 = vxpose.xlu1.b32.cont [11/15] (short) (narrow) %v2371_v12, 16  ;;  %1277 = vxpose.xlu0.b32.cont [11/16] (narrow) %v3179_v44, 16  ;;  %v2839_v12 = vrot.slane %v2751_v5, %v1333_v24  ;;  %v3187_v44 = vld [vmem:[#allocation36_spill] sm:$0xff] }
 0x369   : > { %1310 = vxpose.xlu1.b32.cont [12/15] (short) (narrow) %v2381_v16, 16  ;;  %1278 = vxpose.xlu0.b32.cont [12/16] (narrow) %v3180_v9, 16  ;;  %v2843_v16 = vpop.trf.xlu1  ;;  %v3189_v9 = vld [vmem:[#allocation38_spill] sm:$0xff] }
 0x36d   : > { %1311 = vxpose.xlu1.b32.cont [13/15] (short) (narrow) %v2205_v46, 16  ;;  %1279 = vxpose.xlu0.b32.cont [13/16] (narrow) %v3181_v8, 16  ;;  %v2848_v46 = vrot.slane %v2751_v5, %v1257_v40  ;;  %v3186_v5 = vld [vmem:[#allocation35_spill] sm:$0xff] }
 0x36e   : > { %v3190_v8 = vld [vmem:[#allocation39_spill] sm:$0xff] }
 0x371   : > { %1312 = vxpose.xlu1.b32.cont [14/15] (short) (narrow) %v2220_v61, 16  ;;  %1280 = vxpose.xlu0.b32.cont [14/16] (narrow) %v2198_v41, 16  ;;  %v1412_v41 = vrot.slane %v2746_v1, %v1411_v53  ;;  %v3191_v53 = vld [vmem:[#allocation40_spill] sm:$0xff] }
 0x375   : > { %1313 = vxpose.xlu1.b32.end [15/15] (short) (narrow) %v3165_v21, 16  ;;  %1281 = vxpose.xlu0.b32.cont [15/16] (narrow) %v2227_v6, 16 }
 0x379   : > { %1223 = vxpose.xlu1.b32.start [1/16] (narrow) %v2591_v54, 16  ;;  %1282 = vxpose.xlu0.b32.end [16/16] (narrow) %v3182_v51, 16  ;;  %v1393_v25 = vpop.trf.xlu1  ;;  %v1361_v28 = vpop.trf.xlu0  ;;  %v3192_v51 = vld [vmem:[#allocation41_spill] sm:$0xff] }
 0x37a   : > { %v1418_v40 = vmul.f32 %v1416_v33, %v1393_v25  ;;  %v1417_v63 = vmul.f32 %v1412_v41, %v1361_v28  ;;  %v1187_v25 = vrot.slane %v3165_v21, 2  ;;  %v3193_v28 = vld [vmem:[#allocation24_spill] sm:$0xff] }
 0x37d   : > { %1224 = vxpose.xlu1.b32.cont [2/16] (narrow) %v3183_v26, 16  ;;  %1455 = vxpose.xlu0.b32.start [1/16] (narrow) %v3184_v35, 16  ;;  %v1394_v6 = vpop.trf.xlu1  ;;  %v1362_v37 = vpop.trf.xlu0 }
 0x37e   : > { %v1420_v59 = vmul.f32 %v1416_v33, %v1394_v6  ;;  %v1419_v0 = vmul.f32 %v1412_v41, %v1362_v37  ;;  %v3194_v33 = vrot.slane %v2220_v61, 2  ;;  %v1334_v61 = vrot.slane %v2746_v1, %v1333_v24  ;;  %v3197_v1 = vld [vmem:[#allocation28_spill] sm:$0xff]  ;;  %v3198_v24 = vld [vmem:[#allocation29_spill] sm:$0xff] }
 0x380   : > { %1533 = vmatprep.subr.mxu0 %v1420_v59  ;;  %1743 = vmatprep.subr.mxu1 %v1420_v59  ;;  %v1188_v41 = vsel %vm865_vm4, %v3194_v33, %v1187_v25 }
 0x381   : > { %1225 = vxpose.xlu1.b32.cont [3/16] (narrow) %v3184_v35, 16  ;;  %1456 = vxpose.xlu0.b32.cont [2/16] (narrow) %v3185_v43, 16 }
 0x382   : > { %1534 = vmatpush1.msra.mxu0 %v1419_v0  ;;  %1761 = vmatpush1.msra.mxu1 %v1419_v0 }
 0x383   : > { %1535 = vmatprep.subr.mxu0 %v1418_v40  ;;  %1744 = vmatprep.subr.mxu1 %v1418_v40 }
 0x384   : > { %1536 = vmatpush1.msra.mxu0 %v1417_v63  ;;  %1762 = vmatpush1.msra.mxu1 %v1417_v63 }
 0x385   : > { %1226 = vxpose.xlu1.b32.cont [4/16] (narrow) %v3185_v43, 16  ;;  %1457 = vxpose.xlu0.b32.cont [3/16] (narrow) %v3186_v5, 16 }
 0x389   : > { %1227 = vxpose.xlu1.b32.cont [5/16] (narrow) %v3186_v5, 16  ;;  %1458 = vxpose.xlu0.b32.cont [4/16] (narrow) %v3187_v44, 16 }
 0x38d   : > { %1228 = vxpose.xlu1.b32.cont [6/16] (narrow) %v3187_v44, 16  ;;  %1459 = vxpose.xlu0.b32.cont [5/16] (narrow) %v3188_v4, 16 }
 0x391   : > { %1229 = vxpose.xlu1.b32.cont [7/16] (narrow) %v3188_v4, 16  ;;  %1460 = vxpose.xlu0.b32.cont [6/16] (narrow) %v3189_v9, 16 }
 0x395   : > { %1230 = vxpose.xlu1.b32.cont [8/16] (narrow) %v3189_v9, 16  ;;  %1461 = vxpose.xlu0.b32.cont [7/16] (narrow) %v3190_v8, 16 }
 0x399   : > { %1231 = vxpose.xlu1.b32.cont [9/16] (narrow) %v3190_v8, 16  ;;  %1462 = vxpose.xlu0.b32.cont [8/16] (narrow) %v3191_v53, 16 }
 0x39d   : > { %1232 = vxpose.xlu1.b32.cont [10/16] (narrow) %v3191_v53, 16  ;;  %1463 = vxpose.xlu0.b32.cont [9/16] (narrow) %v3192_v51, 16 }
 0x3a1   : > { %1233 = vxpose.xlu1.b32.cont [11/16] (narrow) %v3192_v51, 16  ;;  %1464 = vxpose.xlu0.b32.cont [10/16] (narrow) %v2657_v22, 16 }
 0x3a5   : > { %1234 = vxpose.xlu1.b32.cont [12/16] (narrow) %v2657_v22, 16  ;;  %1465 = vxpose.xlu0.b32.cont [11/16] (narrow) %v2663_v18, 16  ;;  %v3195_v22 = vld [vmem:[#allocation26_spill] sm:$0xff] }
 0x3a6   : > { %v1421_v35 = vsel %vm865_vm4, %v1187_v25, %v3195_v22 }
 0x3a9   : > { %1235 = vxpose.xlu1.b32.cont [13/16] (narrow) %v2663_v18, 16  ;;  %1466 = vxpose.xlu0.b32.cont [12/16] (narrow) %v2670_v31, 16 }
 0x3ad   : > { %1236 = vxpose.xlu1.b32.cont [14/16] (narrow) %v2670_v31, 16  ;;  %1467 = vxpose.xlu0.b32.cont [13/16] (narrow) %v3193_v28, 16 }
 0x3b1   : > { %1237 = vxpose.xlu1.b32.cont [15/16] (narrow) %v3193_v28, 16  ;;  %1468 = vxpose.xlu0.b32.cont [14/16] (narrow) %v1188_v41, 16 }
 0x3b5   : > { %1238 = vxpose.xlu1.b32.end [16/16] (narrow) %v1188_v41, 16  ;;  %1469 = vxpose.xlu0.b32.cont [15/16] (narrow) %v1421_v35, 16 }
 0x3b9   : > { %1423 = vxpose.xlu1.b32.start [1/16] (narrow) %v2413_v45, 16  ;;  %1470 = vxpose.xlu0.b32.end [16/16] (narrow) %v3195_v22, 16  ;;  %v1315_v18 = vpop.trf.xlu1  ;;  %v1283_v31 = vpop.trf.xlu0  ;;  %v1500_v45 = vld [vmem:[%s3051_s3 + $0x8] sm:$0xff] }
 0x3ba   : > { %v1340_v37 = vmul.f32 %v2839_v12, %v1315_v18  ;;  %v1339_v40 = vmul.f32 %v1334_v61, %v1283_v31  ;;  %1733 = vmatprep.mubr.msk.f32.mxu0 %vm1523_vm5, %v1500_v45 }
 0x3bd   : > { %1424 = vxpose.xlu1.b32.cont [2/16] (narrow) %v2419_v34, 16  ;;  %v1316_v21 = vpop.trf.xlu1  ;;  %v1284_v6 = vpop.trf.xlu0  ;;  %v3196_v34 = vld [vmem:[#allocation27_spill] sm:$0xff] }
 0x3be   : > { %v1342_v59 = vmul.f32 %v2839_v12, %v1316_v21  ;;  %v1341_v0 = vmul.f32 %v1334_v61, %v1284_v6 }
 0x3c0   : > { %1537 = vmatprep.subr.mxu0 %v1342_v59  ;;  %1745 = vmatprep.subr.mxu1 %v1342_v59 }
 0x3c1   : > { %1425 = vxpose.xlu1.b32.cont [3/16] (narrow) %v2425_v62, 16  ;;  %1538 = vmatpush1.msra.mxu0 %v1341_v0  ;;  %v1505_v62 = vld [vmem:[%s3052_s4] sm:$0xff] }
 0x3c2   : > { %1763 = vmatpush1.msra.mxu1 %v1341_v0  ;;  %1539 = vmatprep.subr.mxu0 %v1340_v37 }
 0x3c3   : > { %1746 = vmatprep.subr.mxu1 %v1340_v37  ;;  %1540 = vmatpush1.msra.mxu0 %v1339_v40 }
 0x3c4   : > { %1764 = vmatpush1.msra.mxu1 %v1339_v40 }
 0x3c5   : > { %1426 = vxpose.xlu1.b32.cont [4/16] (narrow) %v2431_v50, 16 }
 0x3c9   : > { %1427 = vxpose.xlu1.b32.cont [5/16] (narrow) %v2437_v58, 16 }
 0x3cd   : > { %1428 = vxpose.xlu1.b32.cont [6/16] (narrow) %v2443_v23, 16 }
 0x3d1   : > { %1429 = vxpose.xlu1.b32.cont [7/16] (narrow) %v3196_v34, 16 }
 0x3d5   : > { %1430 = vxpose.xlu1.b32.cont [8/16] (narrow) %v3197_v1, 16 }
 0x3d9   : > { %1431 = vxpose.xlu1.b32.cont [9/16] (narrow) %v3198_v24, 16 }
 0x3dd   : > { %1432 = vxpose.xlu1.b32.cont [10/16] (narrow) %v3163_v38, 16 }
 0x3e1   : > { %1433 = vxpose.xlu1.b32.cont [11/16] (narrow) %v3164_v30, 16 }
 0x3e2   : > { %1510 = vperm.xlu0 %1829, %v1505_v62  }
 0x3e5   : > { %1434 = vxpose.xlu1.b32.cont [12/16] (narrow) %v2480_v14, 16  ;;  %v1732_v14 = vld [vmem:[%s3053_s5 + $0x18] ss:$0 sm:$0xff] }
 0x3e9   : > { %1435 = vxpose.xlu1.b32.cont [13/16] (narrow) %v2242_v11, 16 }
 0x3ed   : > { %1436 = vxpose.xlu1.b32.cont [14/16] (narrow) %v2585_v27, 16 }
 0x3f1   : > { %1437 = vxpose.xlu1.b32.cont [15/16] (narrow) %v2591_v54, 16  ;;  %v1506_v54 = vld [vmem:[%s3052_s4 + $0x8] sm:$0xff] }
 0x3f5   : > { %1438 = vxpose.xlu1.b32.end [16/16] (narrow) %v3183_v26, 16  ;;  %v1239_v50 = vpop.trf.xlu1 }
 0x3f6   : > { %v1264_v23 = vmul.f32 %v2848_v46, %v1239_v50 }
 0x3f9   : > { %v1240_v58 = vpop.trf.xlu1  ;;  %v1471_v27 = vpop.trf.xlu0 }
 0x3fa   : > { %v1266_v38 = vmul.f32 %v2848_v46, %v1240_v58 }
 0x3fc   : > { %1541 = vmatprep.subr.mxu0 %v1266_v38  ;;  %1747 = vmatprep.subr.mxu1 %v1266_v38 }
 0x3fd   : > { %1542 = vmatpush1.msra.mxu0 %v2827_v56  ;;  %1765 = vmatpush1.msra.mxu1 %v2827_v56  ;;  %v1472_v11 = vpop.trf.xlu0 }
 0x3fe   : > { %1543 = vmatprep.subr.mxu0 %v1264_v23  ;;  %1748 = vmatprep.subr.mxu1 %v1264_v23  ;;  %v1498_v30 = vmul.f32 %v1732_v14, %v1472_v11 }
 0x3ff   : > { %1544 = vmatpush1.msra.mxu0 %v2825_v52  ;;  %1766 = vmatpush1.msra.mxu1 %v2825_v52 }
 0x400   : > { %1545 = vmatprep.subr.mxu0 %v2843_v16  ;;  %1749 = vmatprep.subr.mxu1 %v2843_v16 }
 0x401   : > { %1546 = vmatpush1.msra.mxu0 %v2817_v29  ;;  %1767 = vmatpush1.msra.mxu1 %v2817_v29 }
 0x402   : > { %1547 = vmatprep.subr.mxu0 %v2833_v17  ;;  %1750 = vmatprep.subr.mxu1 %v2833_v17 }
 0x403   : > { %1548 = vmatpush1.msra.mxu0 %v2811_v19  ;;  %1768 = vmatpush1.msra.mxu1 %v2811_v19 }
 0x404   : > { %1549 = vmatprep.subr.mxu0 %v2780_v57  ;;  %1751 = vmatprep.subr.mxu1 %v2780_v57 }
 0x405   : > { %1550 = vmatpush1.msra.mxu0 %v2805_v39  ;;  %1769 = vmatpush1.msra.mxu1 %v2805_v39 }
 0x406   : > { %1551 = vmatprep.subr.mxu0 %v2776_v32  ;;  %1752 = vmatprep.subr.mxu1 %v2776_v32 }
 0x407   : > { %1552 = vmatpush1.msra.mxu0 %v2800_v3  ;;  %1770 = vmatpush1.msra.mxu1 %v2800_v3 }
 0x408   : > { %1553 = vmatprep.subr.mxu0 %v2813_v20  ;;  %1753 = vmatprep.subr.mxu1 %v2813_v20 }
 0x409   : > { %1554 = vmatpush1.msra.mxu0 %v2791_v13  ;;  %1771 = vmatpush1.msra.mxu1 %v2791_v13  ;;  %v1504_v13 = vld [vmem:[%s3051_s3 + $0x28] sm:$0xff] }
 0x40a   : > { %1555 = vmatprep.subr.mxu0 %v2807_v55  ;;  %1754 = vmatprep.subr.mxu1 %v2807_v55 }
 0x40b   : > { %1556 = vmatpush1.msra.mxu0 %v2788_v48  ;;  %1772 = vmatpush1.msra.mxu1 %v2788_v48  ;;  %v1501_v48 = vld [vmem:[%s3051_s3 + $0x10] sm:$0xff] }
 0x40c   : > { %1557 = vmatprep.subr.mxu0 %v2798_v2  ;;  %1755 = vmatprep.subr.mxu1 %v2798_v2 }
 0x40d   : > { %1558 = vmatpush1.msra.mxu0 %v2778_v36  ;;  %1773 = vmatpush1.msra.mxu1 %v2778_v36 }
 0x40e   : > { %1559 = vmatprep.subr.mxu0 %v2793_v47  ;;  %1756 = vmatprep.subr.mxu1 %v2793_v47  ;;  %v1503_v47 = vld [vmem:[%s3051_s3 + $0x20] sm:$0xff] }
 0x40f   : > { %1560 = vmatpush1.msra.mxu0 %v2774_v49  ;;  %1774 = vmatpush1.msra.mxu1 %v2774_v49 }
 0x410   : > { %1561 = vmatprep.subr.mxu0 %v2767_v42  ;;  %1757 = vmatprep.subr.mxu1 %v2767_v42  ;;  %v1507_v42 = vld [vmem:[%s3052_s4 + $0x10] sm:$0xff] }
 0x411   : > { %1562 = vmatpush1.msra.mxu0 %v2764_v15  ;;  %1775 = vmatpush1.msra.mxu1 %v2764_v15  ;;  %v1731_v15 = vld [vmem:[%s3053_s5 + $0x10] ss:$0 sm:$0xff] }
 0x412   : > { %1563 = vmatprep.subr.mxu0 %v2762_v10  ;;  %1758 = vmatprep.subr.mxu1 %v2762_v10  ;;  %v1496_v10 = vmul.f32 %v1732_v14, %v1471_v27 }
 0x413   : > { %1515 = vperm.xlu1 %1830, %v1506_v54   ;;  %1564 = vmatpush1.msra.mxu0 %v2760_v7 }
 0x414   : > { %1776 = vmatpush1.msra.mxu1 %v2760_v7  ;;  %1593 = vmatprep.subr.mxu0 %v1498_v30  ;;  %v1499_v7 = vld [vmem:[%s3051_s3] sm:$0xff] }
 0x415   : > { %1759 = vmatprep.subr.mxu1 %v1498_v30 }
 0x417   : > { %1520 = vperm.xlu1 %1830, %v1507_v42  }
 0x435   : > { %v1439_v49 = vpop.trf.xlu1 }
 0x436   : > { %v1495_v57 = vmul.f32 %v1731_v15, %v1439_v49 }
 0x439   : > { %v1440_v32 = vpop.trf.xlu1 }
 0x43a   : > { %v1497_v36 = vmul.f32 %v1731_v15, %v1440_v32 }
 0x43c   : > { %1594 = vmatpush2.msra.mxu0 %v1497_v36  ;;  %1777 = vmatpush2.msra.mxu1 %v1497_v36 }
 0x43d   : > { %1595 = vmatprep.subr.mxu0 %v1496_v10  ;;  %1760 = vmatprep.subr.mxu1 %v1496_v10 }
 0x43e   : > { %1596 = vmatpush2.msra.mxu0 %v1495_v57  ;;  %1778 = vmatpush2.msra.mxu1 %v1495_v57 }
 0x43f   : > { %1598 = vmatmul.mubr.f32.vlgmr.msra.gmra.mxu0 %v1499_v7  ;;  %1604 = vmatmul.mubr.f32.vlgmr.msra.gmra.mxu1 %v1501_v48 }
 0x440   : > { %1735 = vmatprep.mubr.msk.f32.mxu1 %vm1523_vm5, %v1504_v13 }
 0x443   : > { %1610 = vmatmul.mubr.f32.gmra.mxu1 %v1503_v47 }
 0x45d   : > { %v1511_v3 = vpop.permute.xlu0 %1510 }
 0x48e   : > { %v1516_v2 = vpop.permute.xlu1 %1515 }
 0x492   : > { %v1521_v46 = vpop.permute.xlu1 %1520 }
 0x4ff   : > { %v1599_v39 = vpop.f32.mrf.mxu0  ;;  %v1605_v55 = vpop.f32.mrf.mxu1 }
 0x500   : > { %v1600_v19 = vadd.f32 %v1599_v39, %v1511_v3  ;;  %v1606_v20 = vadd.f32 %v1605_v55, %v1516_v2 }
 0x501   : > { %v1601_v29 = vpop.f32.mrf.mxu0  ;;  %v1607_v52 = vpop.f32.mrf.mxu1 }
 0x502   : > { %v1616_v56 = vmax.f32 %v1600_v19, 0.0  ;;  %v1618_v17 = vmax.f32 %v1606_v20, 0.0  ;;  %v1602_v12 = vadd.f32 %v1601_v29, %v1511_v3  ;;  %v1608_v16 = vadd.f32 %v1607_v52, %v1516_v2 }
 0x503   : > { %v1611_v26 = vpop.f32.mrf.mxu1 }
 0x504   : > { %1624 = vst [vmem:[%s2095_s7 + $0x10] sm:$0xff] %v1616_v56  ;;  %1626 = vst [vmem:[%s2095_s7 + $0x20] sm:$0xff] %v1618_v17  ;;  %v1617_v63 = vmax.f32 %v1602_v12, 0.0  ;;  %v1619_v43 = vmax.f32 %v1608_v16, 0.0  ;;  %v1612_v5 = vadd.f32 %v1611_v26, %v1521_v46 }
 0x505   : > { %v1613_v44 = vpop.f32.mrf.mxu1 }
 0x506   : > { %1625 = vst [vmem:[%s2095_s7 + $0x18] sm:$0xff] %v1617_v63  ;;  %1627 = vst [vmem:[%s2095_s7 + $0x28] sm:$0xff] %v1619_v43  ;;  %v1620_v4 = vmax.f32 %v1612_v5, 0.0  ;;  %v1614_v9 = vadd.f32 %v1613_v44, %v1521_v46 }
 0x508   : > { %1628 = vst [vmem:[%s2095_s7 + $0x30] sm:$0xff] %v1620_v4  ;;  %v1621_v8 = vmax.f32 %v1614_v9, 0.0 }
 0x50a   : > { %1629 = vst [vmem:[%s2095_s7 + $0x38] sm:$0xff] %v1621_v8 }
 0x50b   : > { %1873 = shalt.err (!%p1870_p10)
}
 0x50c   : > { %s1874_s7 = scalar_lea.hbm %s3003_s8, 1024  ;;  %s1878_s28 = scalar_lea.hbm %s3054_s6, 2048 }
 0x50d   : > { %p1875_p2 = scmp.ne.s32.totalorder %s3003_s8, %s1874_s7  ;;  %p1879_p7 = scmp.lt.s32.totalorder %s3003_s8, %s3054_s6 }
 0x50e   : > { %p1880_p0 = scmp.lt.s32.totalorder %s1878_s28, %s1874_s7 }
 0x50f   : > { %p1876_p4 = pnand %p1875_p2, %p3199_p12 }
 0x510   : > { %p1881_p6 = por %p1880_p0, %p1879_p7 }
 0x511   : > { %p1877_p9 = pneg %p1876_p4 }
 0x513   : > { %p1882_p11 = pnand %p1881_p6, %p1877_p9 }
 0x515   : > { %1885 = shalt.err (!%p1882_p11)
}
 0x516   : > { %s1930_s19 = smov 256   ;;  %s1931_s20 = smov 16  }
 0x517   : > { %1781 = dma.vmem_to_hbm [thread:$0]  (%p3199_p12), %s2996_s16, 1024, %s3003_s8, %s1631_s12, %s1930_s19, %s1930_s19, %s1931_s20  }
 0x518 PF: > { %s1659_s25 = sand.u32 1, %s1912_s21   ;;  %p3200_p13 = scmp.ne.s32.totalorder %s3117_s10, 0 }
 0x519   : > { %p3201_p1 = scmp.ge.s32.totalorder %s1924_s24, 2  ;;  %s1660_s13 = scalar_lea.sflag [#allocation4], %s1659_s25 }
 0x51b   : > { %p1788_p3 = pnand %p3201_p1, %p3200_p13 }
 0x51d   : > { %p1789_p5 = pneg %p1788_p3 }
 0x51f   : > { %1907 = dma.done.wait (%p1789_p5), %s1660_s13, 1024  }
 0x520   : > { %1909 = vsyncadd (%p1789_p5), %s1660_s13, 4294966272  ;;  %p19_p8 = scmp.ge.s32.totalorder %s1992_s27, 4   ;;  %s3202_s21 = smov %s1916_s22 }
 0x521   : > { %s3203_s22 = smov %s1920_s23  ;;  %s3204_s23 = smov %s2004_s30 }
 0x522   : > { %s3205_s24 = smov %s1992_s27  ;;  %21 = sbr.rel (!%p19_p8) target bundleno = 5 (0x5), region = 89 }
 0x527   :  { %1665 = vsyncpa [#allocation3], 1 }
 0x528   :  { %1667 = vsyncpa [#allocation3 + $0x1], 1 }
 0x529   :  { %1668 = vsyncpa [#allocation4], 1 }
 0x52a   :  { %1670 = vsyncpa [#allocation4 + $0x1], 1 }

</bundles_post_ra>
